<compile_context>
chip_gen: v7x
topology: tpu7x:2x2x1
jax: 0.10.0
libtpu: 0.0.40
codegen_flags: <defaults>
</compile_context>

<pallas_src>
import functools

import jax
import jax.numpy as jnp
from jax.experimental import pallas as pl
from jax.experimental.pallas import tpu as pltpu


def _round_up(a, m):
    return (a + m - 1) // m * m


def _largest_divisor(n, cap):
    cap = max(1, min(cap, n))
    for d in range(cap, 0, -1):
        if n % d == 0:
            return d
    return 1


def _divisor_tile_t(t128, cap):
    """Largest multiple of 128 that divides t128 (itself a 128-multiple) and is <= cap."""
    best, d, top = 128, 128, min(cap, t128)
    while d <= top:
        if t128 % d == 0:
            best = d
        d += 128
    return best


def _latent_kernel(num_hidden_layers, bm_blk, *refs):
    if num_hidden_layers > 0:
        (x_ref, w_in_ref, b_in_ref, w_hid_ref, b_hid_ref,
         w_out_ref, b_out_ref, mu_ref, var_ref) = refs
    else:
        (x_ref, w_in_ref, b_in_ref,
         w_out_ref, b_out_ref, mu_ref, var_ref) = refs
        w_hid_ref = b_hid_ref = None

    l_out = mu_ref.shape[1]

    # Tiny resident weights: load once per grid step, reuse across all bm rows.
    w_in = w_in_ref[...]
    b_in = b_in_ref[...]
    w_out = w_out_ref[...]
    b_out = b_out_ref[...]

    # Small static unroll over the bm rows of this block: amortizes per-grid-step overhead;
    # each iteration ends with stores to the output refs, so only one row's temporaries
    # (h/out slabs) are live at a time -> bounded vreg pressure even at larger tile_t.
    for m in range(bm_blk):
        x = x_ref[m].astype(jnp.bfloat16)                             # (C_in, tile_t)
        # enc_in + ReLU: (H, C_in) @ (C_in, tile_t) -> (H, tile_t), f32 accumulate.
        h = jnp.dot(w_in, x, preferred_element_type=jnp.float32)
        h = jnp.maximum(h + b_in, 0.0)
        # hidden 1x1 convs + ReLU.
        for i in range(num_hidden_layers):
            h = jnp.dot(w_hid_ref[i], h.astype(jnp.bfloat16),
                        preferred_element_type=jnp.float32)
            h = jnp.maximum(h + b_hid_ref[i], 0.0)
        # Fused output heads: (2*L_out, H) @ (H, tile_t); split rows into mu / sigma paths.
        out = jnp.dot(w_out, h.astype(jnp.bfloat16),
                      preferred_element_type=jnp.float32) + b_out
        mu = out[:l_out]
        sigma = 0.1 + 0.9 * jax.nn.softplus(out[l_out:])              # f32 EUP path
        mu_ref[m] = mu.astype(mu_ref.dtype)
        var_ref[m] = (sigma * sigma).astype(var_ref.dtype)


def pack_latent_params(params, *, num_hidden_layers):
    """One-time weight packing (call once, OUTSIDE the jitted per-call path)."""
    w_in, b_in, w_hid, b_hid, w_o1, b_o1, w_o2, b_o2 = params
    w_in_t = jnp.transpose(w_in).astype(jnp.bfloat16)                       # (H, C_in)
    b_in_c = jnp.transpose(b_in).astype(jnp.float32)                        # (H, 1)
    w_out_t = jnp.concatenate([jnp.transpose(w_o1), jnp.transpose(w_o2)],
                              axis=0).astype(jnp.bfloat16)                  # (2L, H)
    # FIX: fused output-head bias is a (2*L_out, 1) column (concat transposed biases on axis 0).
    b_out_c = jnp.concatenate([jnp.transpose(b_o1), jnp.transpose(b_o2)],
                              axis=0).astype(jnp.float32)                   # (2L, 1)
    if num_hidden_layers > 0:
        w_hid_t = jnp.transpose(w_hid[:num_hidden_layers], (0, 2, 1)).astype(jnp.bfloat16)
        b_hid_c = jnp.transpose(b_hid[:num_hidden_layers], (0, 2, 1)).astype(jnp.float32)
    else:
        w_hid_t, b_hid_c = None, None
    return (w_in_t, b_in_c, w_hid_t, b_hid_c, w_out_t, b_out_c)


def latent_layer_pallas(x, packed, *, num_hidden_layers, tile_t_cap=512, bm_blk_cap=8,
                        out_dtype=jnp.float32):
    """x: (b, num_m, C_in, t) float32.  packed: output of pack_latent_params.
    Returns (mu, var), each (b, num_m, L_out, t).  Set out_dtype=jnp.bfloat16 to halve
    output HBM traffic if the consumer tolerates it (kernel is store-bound)."""
    b, num_m, c_in, t = x.shape
    w_in_t, b_in_c, w_hid_t, b_hid_c, w_out_t, b_out_c = packed
    hidden = w_in_t.shape[0]
    l_out = w_out_t.shape[0] // 2
    bm = b * num_m

    # No layout transpose of x: just merge the leading dims (free reshape).
    x3 = x.reshape(bm, c_in, t)

    # Divisor-aware lane-dense time tiling: pad only to the next 128 multiple and pick
    # tile_t as a divisor of it -> <128 lanes of padding, and no post-kernel slice copy
    # at all when t is already a multiple of 128.
    t_pad = _round_up(t, 128)
    tile_t = _divisor_tile_t(t_pad, tile_t_cap)
    if t_pad != t:
        x3 = jnp.pad(x3, ((0, 0), (0, 0), (0, t_pad - t)))

    # Several bm rows per grid step (amortize per-step overhead), but keep >= 2 total grid
    # steps so v7x megacore can shard across both TensorCores.
    n_t_steps = t_pad // tile_t
    bm_blk = _largest_divisor(bm, bm_blk_cap)
    if n_t_steps * (bm // bm_blk) < 2 and bm > 1:
        bm_blk = _largest_divisor(bm, max(bm_blk // 2, 1))
    grid = (bm // bm_blk, n_t_steps)

    full2 = lambda m, tt: (0, 0)
    full3 = lambda m, tt: (0, 0, 0)
    xio_map = lambda m, tt: (m, 0, tt)

    in_specs = [
        pl.BlockSpec((bm_blk, c_in, tile_t), xio_map),              # x block
        pl.BlockSpec((hidden, c_in), full2),                        # W_in^T   (resident)
        pl.BlockSpec((hidden, 1), full2),                           # b_in
    ]
    args = [x3, w_in_t, b_in_c]
    if num_hidden_layers > 0:                                       # skip dummy operand at L==0
        in_specs += [
            pl.BlockSpec((num_hidden_layers, hidden, hidden), full3),   # W_hid^T stack
            pl.BlockSpec((num_hidden_layers, hidden, 1), full3),        # b_hid stack
        ]
        args += [w_hid_t, b_hid_c]
    in_specs += [
        pl.BlockSpec((2 * l_out, hidden), full2),                   # fused W_o1|W_o2 ^T
        pl.BlockSpec((2 * l_out, 1), full2),                        # fused b_o1|b_o2
    ]
    args += [w_out_t, b_out_c]

    out_specs = [pl.BlockSpec((bm_blk, l_out, tile_t), xio_map),
                 pl.BlockSpec((bm_blk, l_out, tile_t), xio_map)]
    out_shape = (jax.ShapeDtypeStruct((bm, l_out, t_pad), out_dtype),
                 jax.ShapeDtypeStruct((bm, l_out, t_pad), out_dtype))

    # Advisory cost estimate (softplus = exp + log1p -> 2 transcendentals / element).
    n_tok = bm * t_pad
    flops = 2 * n_tok * (c_in * hidden
                         + num_hidden_layers * hidden * hidden
                         + hidden * 2 * l_out)
    w_bytes = (int(w_in_t.size) * 2 + int(w_out_t.size) * 2
               + (int(w_hid_t.size) * 2 if num_hidden_layers > 0 else 0))
    out_bytes = 2 * n_tok * l_out * jnp.dtype(out_dtype).itemsize
    cost = pl.CostEstimate(flops=int(flops),
                           transcendentals=int(2 * n_tok * l_out),
                           bytes_accessed=int(int(x3.size) * 4 + w_bytes + out_bytes))

    # VMEM/step ~= 2*(bm_blk*c_in*tile_t*4) + 2*2*(bm_blk*l_out*tile_t*itemsize) + bf16
    # weight stack -> a few hundred KiB here; well under the 32 MiB scoped default and
    # v7x's 64 MiB physical.  Set vmem_limit_bytes explicitly if tile_t/hidden are scaled up.
    mu3, var3 = pl.pallas_call(
        functools.partial(_latent_kernel, num_hidden_layers, bm_blk),
        out_shape=out_shape,
        grid_spec=pltpu.PrefetchScalarGridSpec(
            num_scalar_prefetch=0,
            grid=grid,
            in_specs=in_specs,
            out_specs=out_specs,
        ),
        compiler_params=pltpu.CompilerParams(
            dimension_semantics=("parallel", "parallel")),
        cost_estimate=cost,
    )(*args)

    if t_pad != t:  # only when t % 128 != 0 does this slice (and its copy) exist
        mu3 = mu3[..., :t]
        var3 = var3[..., :t]
    mu = mu3.reshape(b, num_m, l_out, t)
    var = var3.reshape(b, num_m, l_out, t)
    return mu, var


def latent_layer_ref(x, params, *, num_hidden_layers):
    """Pure-JAX f32 reference with the module's semantics (for verification)."""
    b, num_m, c_in, t = x.shape
    w_in, b_in, w_hid, b_hid, w_o1, b_o1, w_o2, b_o2 = params
    xt = jnp.transpose(x, (0, 1, 3, 2)).reshape(b * num_m * t, c_in)
    h = jnp.maximum(xt @ w_in + b_in, 0.0)
    for i in range(num_hidden_layers):
        h = jnp.maximum(h @ w_hid[i] + b_hid[i], 0.0)
    mu = h @ w_o1 + b_o1
    sigma = 0.1 + 0.9 * jax.nn.softplus(h @ w_o2 + b_o2)
    lo = w_o1.shape[1]
    mu = jnp.transpose(mu.reshape(b, num_m, t, lo), (0, 1, 3, 2))
    var = jnp.transpose((sigma * sigma).reshape(b, num_m, t, lo), (0, 1, 3, 2))
    return mu, var


def init_params(key, tcn_dim, latent_dim_in, latent_dim_out, hidden_dim, num_hidden_layers):
    """Deterministic synthetic params.  Weights stored (C_in, C_out) (transposed vs the
    PyTorch Conv1d (C_out, C_in, 1) layout); pack_latent_params re-packs them for the kernel."""
    c_in = tcn_dim + latent_dim_in
    ks = jax.random.split(key, 8)
    sc = 0.1
    w_in = sc * jax.random.normal(ks[0], (c_in, hidden_dim), jnp.float32)
    b_in = sc * jax.random.normal(ks[1], (1, hidden_dim), jnp.float32)
    n_stack = max(num_hidden_layers, 1)
    w_hid = sc * jax.random.normal(ks[2], (n_stack, hidden_dim, hidden_dim), jnp.float32)
    b_hid = sc * jax.random.normal(ks[3], (n_stack, 1, hidden_dim), jnp.float32)
    w_o1 = sc * jax.random.normal(ks[4], (hidden_dim, latent_dim_out), jnp.float32)
    b_o1 = sc * jax.random.normal(ks[5], (1, latent_dim_out), jnp.float32)
    w_o2 = sc * jax.random.normal(ks[6], (hidden_dim, latent_dim_out), jnp.float32)
    b_o2 = sc * jax.random.normal(ks[7], (1, latent_dim_out), jnp.float32)
    return (w_in, b_in, w_hid, b_hid, w_o1, b_o1, w_o2, b_o2)


if __name__ == "__main__":
    # x: (b, num_m, tcn_dim + latent_dim_in, t).  t is a multiple of 128 so the time axis is
    # lane-dense with zero padding; bm=8 -> bm_blk=4 gives a 2-step all-parallel grid (both
    # v7x TensorCores busy, per-step overhead amortized over 4 rows).
    b, num_m, t = 2, 4, 256
    tcn_dim, latent_dim_in, latent_dim_out = 8, 8, 16
    hidden_dim, num_hidden_layers = 32, 2

    key = jax.random.PRNGKey(0)
    kx, kp = jax.random.split(key)
    x = jax.random.normal(kx, (b, num_m, tcn_dim + latent_dim_in, t), jnp.float32)
    params = init_params(kp, tcn_dim, latent_dim_in, latent_dim_out,
                         hidden_dim, num_hidden_layers)

    # Pre-pack weights once (hoisted out of the per-call path).
    packed = pack_latent_params(params, num_hidden_layers=num_hidden_layers)
    packed = jax.block_until_ready(packed)

    fwd = jax.jit(functools.partial(latent_layer_pallas,
                                    num_hidden_layers=num_hidden_layers))
    mu, var = fwd(x, packed)
    jax.block_until_ready((mu, var))

    mu_ref, var_ref = latent_layer_ref(x, params, num_hidden_layers=num_hidden_layers)
    assert mu.shape == (b, num_m, latent_dim_out, t)
    assert var.shape == (b, num_m, latent_dim_out, t)
    # bf16 MXU operands with f32 accumulation -> loosened tolerance vs the f32 reference.
    assert jnp.allclose(mu, mu_ref, atol=5e-2, rtol=5e-2)
    assert jnp.allclose(var, var_ref, atol=5e-2, rtol=5e-2)

    print("KERNEL_OK")
</pallas_src>

<mosaic_0001>
module attributes {stable_mosaic.version = 11 : i64} {
  func.func @_latent_kernel(%arg0: i32, %arg1: i32, %arg2: memref<4x16x256xf32, #tpu.memory_space<vmem>>, %arg3: memref<32x16xbf16, #tpu.memory_space<vmem>>, %arg4: memref<32x1xf32, #tpu.memory_space<vmem>>, %arg5: memref<2x32x32xbf16, #tpu.memory_space<vmem>>, %arg6: memref<2x32x1xf32, #tpu.memory_space<vmem>>, %arg7: memref<32x32xbf16, #tpu.memory_space<vmem>>, %arg8: memref<32x1xf32, #tpu.memory_space<vmem>>, %arg9: memref<4x16x256xf32, #tpu.memory_space<vmem>>, %arg10: memref<4x16x256xf32, #tpu.memory_space<vmem>>) attributes {dimension_semantics = [#tpu.dimension_semantics<parallel>, #tpu.dimension_semantics<parallel>], iteration_bounds = array<i64: 2, 1>, scalar_prefetch = 0 : i64, scratch_operands = 0 : i64, tpu.core_type = #tpu.core_type<tc>, window_params = [{transform_indices = @transform_0, window_bounds = array<i64: 4, 16, 256>}, {pipeline_mode = #tpu.pipeline_mode<synchronous>, transform_indices = @transform_1, window_bounds = array<i64: 32, 16>}, {pipeline_mode = #tpu.pipeline_mode<synchronous>, transform_indices = @transform_2, window_bounds = array<i64: 32, 1>}, {pipeline_mode = #tpu.pipeline_mode<synchronous>, transform_indices = @transform_3, window_bounds = array<i64: 2, 32, 32>}, {pipeline_mode = #tpu.pipeline_mode<synchronous>, transform_indices = @transform_4, window_bounds = array<i64: 2, 32, 1>}, {pipeline_mode = #tpu.pipeline_mode<synchronous>, transform_indices = @transform_5, window_bounds = array<i64: 32, 32>}, {pipeline_mode = #tpu.pipeline_mode<synchronous>, transform_indices = @transform_6, window_bounds = array<i64: 32, 1>}, {transform_indices = @transform_7, window_bounds = array<i64: 4, 16, 256>}, {transform_indices = @transform_8, window_bounds = array<i64: 4, 16, 256>}]} {
    %c0 = arith.constant 0 : index
    %c0_0 = arith.constant 0 : index
    %0 = vector.load %arg3[%c0, %c0_0] : memref<32x16xbf16, #tpu.memory_space<vmem>>, vector<32x16xbf16>
    %c0_1 = arith.constant 0 : index
    %c0_2 = arith.constant 0 : index
    %1 = vector.load %arg4[%c0_1, %c0_2] : memref<32x1xf32, #tpu.memory_space<vmem>>, vector<32x1xf32>
    %c0_3 = arith.constant 0 : index
    %c0_4 = arith.constant 0 : index
    %2 = vector.load %arg7[%c0_3, %c0_4] : memref<32x32xbf16, #tpu.memory_space<vmem>>, vector<32x32xbf16>
    %c0_5 = arith.constant 0 : index
    %c0_6 = arith.constant 0 : index
    %3 = vector.load %arg8[%c0_5, %c0_6] : memref<32x1xf32, #tpu.memory_space<vmem>>, vector<32x1xf32>
    %c0_7 = arith.constant 0 : index
    %c0_8 = arith.constant 0 : index
    %c0_9 = arith.constant 0 : index
    %4 = vector.load %arg2[%c0_7, %c0_8, %c0_9] : memref<4x16x256xf32, #tpu.memory_space<vmem>>, vector<1x16x256xf32>
    %5 = vector.shape_cast %4 : vector<1x16x256xf32> to vector<16x256xf32>
    %6 = arith.truncf %5 : vector<16x256xf32> to vector<16x256xbf16>
    %cst = arith.constant dense<0.000000e+00> : vector<32x256xf32>
    %7 = tpu.matmul %0, %6, %cst {dimension_numbers = #tpu.dot_dimension_numbers<[1], [0], [0], [1], [0, 0, 1, 1], [], []>} : vector<32x16xbf16>, vector<16x256xbf16>, vector<32x256xf32> -> vector<32x256xf32>
    %8 = vector.broadcast %1 : vector<32x1xf32> to vector<32x256xf32>
    %9 = arith.addf %7, %8 : vector<32x256xf32>
    %cst_10 = arith.constant 0.000000e+00 : f32
    %10 = vector.broadcast %cst_10 : f32 to vector<32x256xf32>
    %11 = arith.maximumf %9, %10 : vector<32x256xf32>
    %c0_11 = arith.constant 0 : index
    %c0_12 = arith.constant 0 : index
    %c0_13 = arith.constant 0 : index
    %12 = vector.load %arg5[%c0_11, %c0_12, %c0_13] : memref<2x32x32xbf16, #tpu.memory_space<vmem>>, vector<1x32x32xbf16>
    %13 = vector.shape_cast %12 : vector<1x32x32xbf16> to vector<32x32xbf16>
    %14 = arith.truncf %11 : vector<32x256xf32> to vector<32x256xbf16>
    %cst_14 = arith.constant dense<0.000000e+00> : vector<32x256xf32>
    %15 = tpu.matmul %13, %14, %cst_14 {dimension_numbers = #tpu.dot_dimension_numbers<[1], [0], [0], [1], [0, 0, 1, 1], [], []>} : vector<32x32xbf16>, vector<32x256xbf16>, vector<32x256xf32> -> vector<32x256xf32>
    %c0_15 = arith.constant 0 : index
    %c0_16 = arith.constant 0 : index
    %c0_17 = arith.constant 0 : index
    %16 = vector.load %arg6[%c0_15, %c0_16, %c0_17] : memref<2x32x1xf32, #tpu.memory_space<vmem>>, vector<1x32x1xf32>
    %17 = vector.shape_cast %16 : vector<1x32x1xf32> to vector<32x1xf32>
    %18 = vector.broadcast %17 : vector<32x1xf32> to vector<32x256xf32>
    %19 = arith.addf %15, %18 : vector<32x256xf32>
    %cst_18 = arith.constant 0.000000e+00 : f32
    %20 = vector.broadcast %cst_18 : f32 to vector<32x256xf32>
    %21 = arith.maximumf %19, %20 : vector<32x256xf32>
    %c1 = arith.constant 1 : index
    %c0_19 = arith.constant 0 : index
    %c0_20 = arith.constant 0 : index
    %22 = vector.load %arg5[%c1, %c0_19, %c0_20] : memref<2x32x32xbf16, #tpu.memory_space<vmem>>, vector<1x32x32xbf16>
    %23 = vector.shape_cast %22 : vector<1x32x32xbf16> to vector<32x32xbf16>
    %24 = arith.truncf %21 : vector<32x256xf32> to vector<32x256xbf16>
    %cst_21 = arith.constant dense<0.000000e+00> : vector<32x256xf32>
    %25 = tpu.matmul %23, %24, %cst_21 {dimension_numbers = #tpu.dot_dimension_numbers<[1], [0], [0], [1], [0, 0, 1, 1], [], []>} : vector<32x32xbf16>, vector<32x256xbf16>, vector<32x256xf32> -> vector<32x256xf32>
    %c1_22 = arith.constant 1 : index
    %c0_23 = arith.constant 0 : index
    %c0_24 = arith.constant 0 : index
    %26 = vector.load %arg6[%c1_22, %c0_23, %c0_24] : memref<2x32x1xf32, #tpu.memory_space<vmem>>, vector<1x32x1xf32>
    %27 = vector.shape_cast %26 : vector<1x32x1xf32> to vector<32x1xf32>
    %28 = vector.broadcast %27 : vector<32x1xf32> to vector<32x256xf32>
    %29 = arith.addf %25, %28 : vector<32x256xf32>
    %cst_25 = arith.constant 0.000000e+00 : f32
    %30 = vector.broadcast %cst_25 : f32 to vector<32x256xf32>
    %31 = arith.maximumf %29, %30 : vector<32x256xf32>
    %32 = arith.truncf %31 : vector<32x256xf32> to vector<32x256xbf16>
    %cst_26 = arith.constant dense<0.000000e+00> : vector<32x256xf32>
    %33 = tpu.matmul %2, %32, %cst_26 {dimension_numbers = #tpu.dot_dimension_numbers<[1], [0], [0], [1], [0, 0, 1, 1], [], []>} : vector<32x32xbf16>, vector<32x256xbf16>, vector<32x256xf32> -> vector<32x256xf32>
    %34 = vector.broadcast %3 : vector<32x1xf32> to vector<32x256xf32>
    %35 = arith.addf %33, %34 : vector<32x256xf32>
    %36 = vector.extract_strided_slice %35 {offsets = [0, 0], sizes = [16, 256], strides = [1, 1]} : vector<32x256xf32> to vector<16x256xf32>
    %37 = vector.extract_strided_slice %35 {offsets = [16, 0], sizes = [16, 256], strides = [1, 1]} : vector<32x256xf32> to vector<16x256xf32>
    %cst_27 = arith.constant 0.000000e+00 : f32
    %38 = vector.broadcast %cst_27 : f32 to vector<16x256xf32>
    %39 = arith.maximumf %37, %38 : vector<16x256xf32>
    %40 = vector.broadcast %cst_27 : f32 to vector<16x256xf32>
    %41 = arith.subf %37, %40 : vector<16x256xf32>
    %42 = arith.cmpf one, %41, %41 : vector<16x256xf32>
    %43 = vector.broadcast %cst_27 : f32 to vector<16x256xf32>
    %44 = arith.addf %37, %43 : vector<16x256xf32>
    %45 = math.absf %41 : vector<16x256xf32>
    %cst_28 = arith.constant 0.000000e+00 : f32
    %46 = vector.broadcast %cst_28 : f32 to vector<16x256xf32>
    %47 = arith.subf %46, %45 : vector<16x256xf32>
    %48 = math.exp %47 : vector<16x256xf32>
    %49 = math.log1p %48 : vector<16x256xf32>
    %50 = arith.addf %39, %49 : vector<16x256xf32>
    %51 = arith.select %42, %44, %50 : vector<16x256xi1>, vector<16x256xf32>
    %cst_29 = arith.constant 0.899999976 : f32
    %52 = vector.broadcast %cst_29 : f32 to vector<16x256xf32>
    %53 = arith.mulf %52, %51 : vector<16x256xf32>
    %cst_30 = arith.constant 1.000000e-01 : f32
    %54 = vector.broadcast %cst_30 : f32 to vector<16x256xf32>
    %55 = arith.addf %54, %53 : vector<16x256xf32>
    %c0_31 = arith.constant 0 : index
    %c0_32 = arith.constant 0 : index
    %c0_33 = arith.constant 0 : index
    %56 = vector.load %arg9[%c0_31, %c0_32, %c0_33] : memref<4x16x256xf32, #tpu.memory_space<vmem>>, vector<1x16x256xf32>
    %57 = vector.shape_cast %56 : vector<1x16x256xf32> to vector<16x256xf32>
    %58 = vector.shape_cast %36 : vector<16x256xf32> to vector<1x16x256xf32>
    tpu.vector_store %arg9[%c0_31, %c0_32, %c0_33], %58 {strides = array<i32>} : memref<4x16x256xf32, #tpu.memory_space<vmem>>, vector<1x16x256xf32>,
    %59 = arith.mulf %55, %55 : vector<16x256xf32>
    %c0_34 = arith.constant 0 : index
    %c0_35 = arith.constant 0 : index
    %c0_36 = arith.constant 0 : index
    %60 = vector.load %arg10[%c0_34, %c0_35, %c0_36] : memref<4x16x256xf32, #tpu.memory_space<vmem>>, vector<1x16x256xf32>
    %61 = vector.shape_cast %60 : vector<1x16x256xf32> to vector<16x256xf32>
    %62 = vector.shape_cast %59 : vector<16x256xf32> to vector<1x16x256xf32>
    tpu.vector_store %arg10[%c0_34, %c0_35, %c0_36], %62 {strides = array<i32>} : memref<4x16x256xf32, #tpu.memory_space<vmem>>, vector<1x16x256xf32>,
    %c1_37 = arith.constant 1 : index
    %c0_38 = arith.constant 0 : index
    %c0_39 = arith.constant 0 : index
    %63 = vector.load %arg2[%c1_37, %c0_38, %c0_39] : memref<4x16x256xf32, #tpu.memory_space<vmem>>, vector<1x16x256xf32>
    %64 = vector.shape_cast %63 : vector<1x16x256xf32> to vector<16x256xf32>
    %65 = arith.truncf %64 : vector<16x256xf32> to vector<16x256xbf16>
    %cst_40 = arith.constant dense<0.000000e+00> : vector<32x256xf32>
    %66 = tpu.matmul %0, %65, %cst_40 {dimension_numbers = #tpu.dot_dimension_numbers<[1], [0], [0], [1], [0, 0, 1, 1], [], []>} : vector<32x16xbf16>, vector<16x256xbf16>, vector<32x256xf32> -> vector<32x256xf32>
    %67 = vector.broadcast %1 : vector<32x1xf32> to vector<32x256xf32>
    %68 = arith.addf %66, %67 : vector<32x256xf32>
    %cst_41 = arith.constant 0.000000e+00 : f32
    %69 = vector.broadcast %cst_41 : f32 to vector<32x256xf32>
    %70 = arith.maximumf %68, %69 : vector<32x256xf32>
    %c0_42 = arith.constant 0 : index
    %c0_43 = arith.constant 0 : index
    %c0_44 = arith.constant 0 : index
    %71 = vector.load %arg5[%c0_42, %c0_43, %c0_44] : memref<2x32x32xbf16, #tpu.memory_space<vmem>>, vector<1x32x32xbf16>
    %72 = vector.shape_cast %71 : vector<1x32x32xbf16> to vector<32x32xbf16>
    %73 = arith.truncf %70 : vector<32x256xf32> to vector<32x256xbf16>
    %cst_45 = arith.constant dense<0.000000e+00> : vector<32x256xf32>
    %74 = tpu.matmul %72, %73, %cst_45 {dimension_numbers = #tpu.dot_dimension_numbers<[1], [0], [0], [1], [0, 0, 1, 1], [], []>} : vector<32x32xbf16>, vector<32x256xbf16>, vector<32x256xf32> -> vector<32x256xf32>
    %c0_46 = arith.constant 0 : index
    %c0_47 = arith.constant 0 : index
    %c0_48 = arith.constant 0 : index
    %75 = vector.load %arg6[%c0_46, %c0_47, %c0_48] : memref<2x32x1xf32, #tpu.memory_space<vmem>>, vector<1x32x1xf32>
    %76 = vector.shape_cast %75 : vector<1x32x1xf32> to vector<32x1xf32>
    %77 = vector.broadcast %76 : vector<32x1xf32> to vector<32x256xf32>
    %78 = arith.addf %74, %77 : vector<32x256xf32>
    %cst_49 = arith.constant 0.000000e+00 : f32
    %79 = vector.broadcast %cst_49 : f32 to vector<32x256xf32>
    %80 = arith.maximumf %78, %79 : vector<32x256xf32>
    %c1_50 = arith.constant 1 : index
    %c0_51 = arith.constant 0 : index
    %c0_52 = arith.constant 0 : index
    %81 = vector.load %arg5[%c1_50, %c0_51, %c0_52] : memref<2x32x32xbf16, #tpu.memory_space<vmem>>, vector<1x32x32xbf16>
    %82 = vector.shape_cast %81 : vector<1x32x32xbf16> to vector<32x32xbf16>
    %83 = arith.truncf %80 : vector<32x256xf32> to vector<32x256xbf16>
    %cst_53 = arith.constant dense<0.000000e+00> : vector<32x256xf32>
    %84 = tpu.matmul %82, %83, %cst_53 {dimension_numbers = #tpu.dot_dimension_numbers<[1], [0], [0], [1], [0, 0, 1, 1], [], []>} : vector<32x32xbf16>, vector<32x256xbf16>, vector<32x256xf32> -> vector<32x256xf32>
    %c1_54 = arith.constant 1 : index
    %c0_55 = arith.constant 0 : index
    %c0_56 = arith.constant 0 : index
    %85 = vector.load %arg6[%c1_54, %c0_55, %c0_56] : memref<2x32x1xf32, #tpu.memory_space<vmem>>, vector<1x32x1xf32>
    %86 = vector.shape_cast %85 : vector<1x32x1xf32> to vector<32x1xf32>
    %87 = vector.broadcast %86 : vector<32x1xf32> to vector<32x256xf32>
    %88 = arith.addf %84, %87 : vector<32x256xf32>
    %cst_57 = arith.constant 0.000000e+00 : f32
    %89 = vector.broadcast %cst_57 : f32 to vector<32x256xf32>
    %90 = arith.maximumf %88, %89 : vector<32x256xf32>
    %91 = arith.truncf %90 : vector<32x256xf32> to vector<32x256xbf16>
    %cst_58 = arith.constant dense<0.000000e+00> : vector<32x256xf32>
    %92 = tpu.matmul %2, %91, %cst_58 {dimension_numbers = #tpu.dot_dimension_numbers<[1], [0], [0], [1], [0, 0, 1, 1], [], []>} : vector<32x32xbf16>, vector<32x256xbf16>, vector<32x256xf32> -> vector<32x256xf32>
    %93 = vector.broadcast %3 : vector<32x1xf32> to vector<32x256xf32>
    %94 = arith.addf %92, %93 : vector<32x256xf32>
    %95 = vector.extract_strided_slice %94 {offsets = [0, 0], sizes = [16, 256], strides = [1, 1]} : vector<32x256xf32> to vector<16x256xf32>
    %96 = vector.extract_strided_slice %94 {offsets = [16, 0], sizes = [16, 256], strides = [1, 1]} : vector<32x256xf32> to vector<16x256xf32>
    %cst_59 = arith.constant 0.000000e+00 : f32
    %97 = vector.broadcast %cst_59 : f32 to vector<16x256xf32>
    %98 = arith.maximumf %96, %97 : vector<16x256xf32>
    %99 = vector.broadcast %cst_59 : f32 to vector<16x256xf32>
    %100 = arith.subf %96, %99 : vector<16x256xf32>
    %101 = arith.cmpf one, %100, %100 : vector<16x256xf32>
    %102 = vector.broadcast %cst_59 : f32 to vector<16x256xf32>
    %103 = arith.addf %96, %102 : vector<16x256xf32>
    %104 = math.absf %100 : vector<16x256xf32>
    %cst_60 = arith.constant 0.000000e+00 : f32
    %105 = vector.broadcast %cst_60 : f32 to vector<16x256xf32>
    %106 = arith.subf %105, %104 : vector<16x256xf32>
    %107 = math.exp %106 : vector<16x256xf32>
    %108 = math.log1p %107 : vector<16x256xf32>
    %109 = arith.addf %98, %108 : vector<16x256xf32>
    %110 = arith.select %101, %103, %109 : vector<16x256xi1>, vector<16x256xf32>
    %cst_61 = arith.constant 0.899999976 : f32
    %111 = vector.broadcast %cst_61 : f32 to vector<16x256xf32>
    %112 = arith.mulf %111, %110 : vector<16x256xf32>
    %cst_62 = arith.constant 1.000000e-01 : f32
    %113 = vector.broadcast %cst_62 : f32 to vector<16x256xf32>
    %114 = arith.addf %113, %112 : vector<16x256xf32>
    %c1_63 = arith.constant 1 : index
    %c0_64 = arith.constant 0 : index
    %c0_65 = arith.constant 0 : index
    %115 = vector.load %arg9[%c1_63, %c0_64, %c0_65] : memref<4x16x256xf32, #tpu.memory_space<vmem>>, vector<1x16x256xf32>
    %116 = vector.shape_cast %115 : vector<1x16x256xf32> to vector<16x256xf32>
    %117 = vector.shape_cast %95 : vector<16x256xf32> to vector<1x16x256xf32>
    tpu.vector_store %arg9[%c1_63, %c0_64, %c0_65], %117 {strides = array<i32>} : memref<4x16x256xf32, #tpu.memory_space<vmem>>, vector<1x16x256xf32>,
    %118 = arith.mulf %114, %114 : vector<16x256xf32>
    %c1_66 = arith.constant 1 : index
    %c0_67 = arith.constant 0 : index
    %c0_68 = arith.constant 0 : index
    %119 = vector.load %arg10[%c1_66, %c0_67, %c0_68] : memref<4x16x256xf32, #tpu.memory_space<vmem>>, vector<1x16x256xf32>
    %120 = vector.shape_cast %119 : vector<1x16x256xf32> to vector<16x256xf32>
    %121 = vector.shape_cast %118 : vector<16x256xf32> to vector<1x16x256xf32>
    tpu.vector_store %arg10[%c1_66, %c0_67, %c0_68], %121 {strides = array<i32>} : memref<4x16x256xf32, #tpu.memory_space<vmem>>, vector<1x16x256xf32>,
    %c2 = arith.constant 2 : index
    %c0_69 = arith.constant 0 : index
    %c0_70 = arith.constant 0 : index
    %122 = vector.load %arg2[%c2, %c0_69, %c0_70] : memref<4x16x256xf32, #tpu.memory_space<vmem>>, vector<1x16x256xf32>
    %123 = vector.shape_cast %122 : vector<1x16x256xf32> to vector<16x256xf32>
    %124 = arith.truncf %123 : vector<16x256xf32> to vector<16x256xbf16>
    %cst_71 = arith.constant dense<0.000000e+00> : vector<32x256xf32>
    %125 = tpu.matmul %0, %124, %cst_71 {dimension_numbers = #tpu.dot_dimension_numbers<[1], [0], [0], [1], [0, 0, 1, 1], [], []>} : vector<32x16xbf16>, vector<16x256xbf16>, vector<32x256xf32> -> vector<32x256xf32>
    %126 = vector.broadcast %1 : vector<32x1xf32> to vector<32x256xf32>
    %127 = arith.addf %125, %126 : vector<32x256xf32>
    %cst_72 = arith.constant 0.000000e+00 : f32
    %128 = vector.broadcast %cst_72 : f32 to vector<32x256xf32>
    %129 = arith.maximumf %127, %128 : vector<32x256xf32>
    %c0_73 = arith.constant 0 : index
    %c0_74 = arith.constant 0 : index
    %c0_75 = arith.constant 0 : index
    %130 = vector.load %arg5[%c0_73, %c0_74, %c0_75] : memref<2x32x32xbf16, #tpu.memory_space<vmem>>, vector<1x32x32xbf16>
    %131 = vector.shape_cast %130 : vector<1x32x32xbf16> to vector<32x32xbf16>
    %132 = arith.truncf %129 : vector<32x256xf32> to vector<32x256xbf16>
    %cst_76 = arith.constant dense<0.000000e+00> : vector<32x256xf32>
    %133 = tpu.matmul %131, %132, %cst_76 {dimension_numbers = #tpu.dot_dimension_numbers<[1], [0], [0], [1], [0, 0, 1, 1], [], []>} : vector<32x32xbf16>, vector<32x256xbf16>, vector<32x256xf32> -> vector<32x256xf32>
    %c0_77 = arith.constant 0 : index
    %c0_78 = arith.constant 0 : index
    %c0_79 = arith.constant 0 : index
    %134 = vector.load %arg6[%c0_77, %c0_78, %c0_79] : memref<2x32x1xf32, #tpu.memory_space<vmem>>, vector<1x32x1xf32>
    %135 = vector.shape_cast %134 : vector<1x32x1xf32> to vector<32x1xf32>
    %136 = vector.broadcast %135 : vector<32x1xf32> to vector<32x256xf32>
    %137 = arith.addf %133, %136 : vector<32x256xf32>
    %cst_80 = arith.constant 0.000000e+00 : f32
    %138 = vector.broadcast %cst_80 : f32 to vector<32x256xf32>
    %139 = arith.maximumf %137, %138 : vector<32x256xf32>
    %c1_81 = arith.constant 1 : index
    %c0_82 = arith.constant 0 : index
    %c0_83 = arith.constant 0 : index
    %140 = vector.load %arg5[%c1_81, %c0_82, %c0_83] : memref<2x32x32xbf16, #tpu.memory_space<vmem>>, vector<1x32x32xbf16>
    %141 = vector.shape_cast %140 : vector<1x32x32xbf16> to vector<32x32xbf16>
    %142 = arith.truncf %139 : vector<32x256xf32> to vector<32x256xbf16>
    %cst_84 = arith.constant dense<0.000000e+00> : vector<32x256xf32>
    %143 = tpu.matmul %141, %142, %cst_84 {dimension_numbers = #tpu.dot_dimension_numbers<[1], [0], [0], [1], [0, 0, 1, 1], [], []>} : vector<32x32xbf16>, vector<32x256xbf16>, vector<32x256xf32> -> vector<32x256xf32>
    %c1_85 = arith.constant 1 : index
    %c0_86 = arith.constant 0 : index
    %c0_87 = arith.constant 0 : index
    %144 = vector.load %arg6[%c1_85, %c0_86, %c0_87] : memref<2x32x1xf32, #tpu.memory_space<vmem>>, vector<1x32x1xf32>
    %145 = vector.shape_cast %144 : vector<1x32x1xf32> to vector<32x1xf32>
    %146 = vector.broadcast %145 : vector<32x1xf32> to vector<32x256xf32>
    %147 = arith.addf %143, %146 : vector<32x256xf32>
    %cst_88 = arith.constant 0.000000e+00 : f32
    %148 = vector.broadcast %cst_88 : f32 to vector<32x256xf32>
    %149 = arith.maximumf %147, %148 : vector<32x256xf32>
    %150 = arith.truncf %149 : vector<32x256xf32> to vector<32x256xbf16>
    %cst_89 = arith.constant dense<0.000000e+00> : vector<32x256xf32>
    %151 = tpu.matmul %2, %150, %cst_89 {dimension_numbers = #tpu.dot_dimension_numbers<[1], [0], [0], [1], [0, 0, 1, 1], [], []>} : vector<32x32xbf16>, vector<32x256xbf16>, vector<32x256xf32> -> vector<32x256xf32>
    %152 = vector.broadcast %3 : vector<32x1xf32> to vector<32x256xf32>
    %153 = arith.addf %151, %152 : vector<32x256xf32>
    %154 = vector.extract_strided_slice %153 {offsets = [0, 0], sizes = [16, 256], strides = [1, 1]} : vector<32x256xf32> to vector<16x256xf32>
    %155 = vector.extract_strided_slice %153 {offsets = [16, 0], sizes = [16, 256], strides = [1, 1]} : vector<32x256xf32> to vector<16x256xf32>
    %cst_90 = arith.constant 0.000000e+00 : f32
    %156 = vector.broadcast %cst_90 : f32 to vector<16x256xf32>
    %157 = arith.maximumf %155, %156 : vector<16x256xf32>
    %158 = vector.broadcast %cst_90 : f32 to vector<16x256xf32>
    %159 = arith.subf %155, %158 : vector<16x256xf32>
    %160 = arith.cmpf one, %159, %159 : vector<16x256xf32>
    %161 = vector.broadcast %cst_90 : f32 to vector<16x256xf32>
    %162 = arith.addf %155, %161 : vector<16x256xf32>
    %163 = math.absf %159 : vector<16x256xf32>
    %cst_91 = arith.constant 0.000000e+00 : f32
    %164 = vector.broadcast %cst_91 : f32 to vector<16x256xf32>
    %165 = arith.subf %164, %163 : vector<16x256xf32>
    %166 = math.exp %165 : vector<16x256xf32>
    %167 = math.log1p %166 : vector<16x256xf32>
    %168 = arith.addf %157, %167 : vector<16x256xf32>
    %169 = arith.select %160, %162, %168 : vector<16x256xi1>, vector<16x256xf32>
    %cst_92 = arith.constant 0.899999976 : f32
    %170 = vector.broadcast %cst_92 : f32 to vector<16x256xf32>
    %171 = arith.mulf %170, %169 : vector<16x256xf32>
    %cst_93 = arith.constant 1.000000e-01 : f32
    %172 = vector.broadcast %cst_93 : f32 to vector<16x256xf32>
    %173 = arith.addf %172, %171 : vector<16x256xf32>
    %c2_94 = arith.constant 2 : index
    %c0_95 = arith.constant 0 : index
    %c0_96 = arith.constant 0 : index
    %174 = vector.load %arg9[%c2_94, %c0_95, %c0_96] : memref<4x16x256xf32, #tpu.memory_space<vmem>>, vector<1x16x256xf32>
    %175 = vector.shape_cast %174 : vector<1x16x256xf32> to vector<16x256xf32>
    %176 = vector.shape_cast %154 : vector<16x256xf32> to vector<1x16x256xf32>
    tpu.vector_store %arg9[%c2_94, %c0_95, %c0_96], %176 {strides = array<i32>} : memref<4x16x256xf32, #tpu.memory_space<vmem>>, vector<1x16x256xf32>,
    %177 = arith.mulf %173, %173 : vector<16x256xf32>
    %c2_97 = arith.constant 2 : index
    %c0_98 = arith.constant 0 : index
    %c0_99 = arith.constant 0 : index
    %178 = vector.load %arg10[%c2_97, %c0_98, %c0_99] : memref<4x16x256xf32, #tpu.memory_space<vmem>>, vector<1x16x256xf32>
    %179 = vector.shape_cast %178 : vector<1x16x256xf32> to vector<16x256xf32>
    %180 = vector.shape_cast %177 : vector<16x256xf32> to vector<1x16x256xf32>
    tpu.vector_store %arg10[%c2_97, %c0_98, %c0_99], %180 {strides = array<i32>} : memref<4x16x256xf32, #tpu.memory_space<vmem>>, vector<1x16x256xf32>,
    %c3 = arith.constant 3 : index
    %c0_100 = arith.constant 0 : index
    %c0_101 = arith.constant 0 : index
    %181 = vector.load %arg2[%c3, %c0_100, %c0_101] : memref<4x16x256xf32, #tpu.memory_space<vmem>>, vector<1x16x256xf32>
    %182 = vector.shape_cast %181 : vector<1x16x256xf32> to vector<16x256xf32>
    %183 = arith.truncf %182 : vector<16x256xf32> to vector<16x256xbf16>
    %cst_102 = arith.constant dense<0.000000e+00> : vector<32x256xf32>
    %184 = tpu.matmul %0, %183, %cst_102 {dimension_numbers = #tpu.dot_dimension_numbers<[1], [0], [0], [1], [0, 0, 1, 1], [], []>} : vector<32x16xbf16>, vector<16x256xbf16>, vector<32x256xf32> -> vector<32x256xf32>
    %185 = vector.broadcast %1 : vector<32x1xf32> to vector<32x256xf32>
    %186 = arith.addf %184, %185 : vector<32x256xf32>
    %cst_103 = arith.constant 0.000000e+00 : f32
    %187 = vector.broadcast %cst_103 : f32 to vector<32x256xf32>
    %188 = arith.maximumf %186, %187 : vector<32x256xf32>
    %c0_104 = arith.constant 0 : index
    %c0_105 = arith.constant 0 : index
    %c0_106 = arith.constant 0 : index
    %189 = vector.load %arg5[%c0_104, %c0_105, %c0_106] : memref<2x32x32xbf16, #tpu.memory_space<vmem>>, vector<1x32x32xbf16>
    %190 = vector.shape_cast %189 : vector<1x32x32xbf16> to vector<32x32xbf16>
    %191 = arith.truncf %188 : vector<32x256xf32> to vector<32x256xbf16>
    %cst_107 = arith.constant dense<0.000000e+00> : vector<32x256xf32>
    %192 = tpu.matmul %190, %191, %cst_107 {dimension_numbers = #tpu.dot_dimension_numbers<[1], [0], [0], [1], [0, 0, 1, 1], [], []>} : vector<32x32xbf16>, vector<32x256xbf16>, vector<32x256xf32> -> vector<32x256xf32>
    %c0_108 = arith.constant 0 : index
    %c0_109 = arith.constant 0 : index
    %c0_110 = arith.constant 0 : index
    %193 = vector.load %arg6[%c0_108, %c0_109, %c0_110] : memref<2x32x1xf32, #tpu.memory_space<vmem>>, vector<1x32x1xf32>
    %194 = vector.shape_cast %193 : vector<1x32x1xf32> to vector<32x1xf32>
    %195 = vector.broadcast %194 : vector<32x1xf32> to vector<32x256xf32>
    %196 = arith.addf %192, %195 : vector<32x256xf32>
    %cst_111 = arith.constant 0.000000e+00 : f32
    %197 = vector.broadcast %cst_111 : f32 to vector<32x256xf32>
    %198 = arith.maximumf %196, %197 : vector<32x256xf32>
    %c1_112 = arith.constant 1 : index
    %c0_113 = arith.constant 0 : index
    %c0_114 = arith.constant 0 : index
    %199 = vector.load %arg5[%c1_112, %c0_113, %c0_114] : memref<2x32x32xbf16, #tpu.memory_space<vmem>>, vector<1x32x32xbf16>
    %200 = vector.shape_cast %199 : vector<1x32x32xbf16> to vector<32x32xbf16>
    %201 = arith.truncf %198 : vector<32x256xf32> to vector<32x256xbf16>
    %cst_115 = arith.constant dense<0.000000e+00> : vector<32x256xf32>
    %202 = tpu.matmul %200, %201, %cst_115 {dimension_numbers = #tpu.dot_dimension_numbers<[1], [0], [0], [1], [0, 0, 1, 1], [], []>} : vector<32x32xbf16>, vector<32x256xbf16>, vector<32x256xf32> -> vector<32x256xf32>
    %c1_116 = arith.constant 1 : index
    %c0_117 = arith.constant 0 : index
    %c0_118 = arith.constant 0 : index
    %203 = vector.load %arg6[%c1_116, %c0_117, %c0_118] : memref<2x32x1xf32, #tpu.memory_space<vmem>>, vector<1x32x1xf32>
    %204 = vector.shape_cast %203 : vector<1x32x1xf32> to vector<32x1xf32>
    %205 = vector.broadcast %204 : vector<32x1xf32> to vector<32x256xf32>
    %206 = arith.addf %202, %205 : vector<32x256xf32>
    %cst_119 = arith.constant 0.000000e+00 : f32
    %207 = vector.broadcast %cst_119 : f32 to vector<32x256xf32>
    %208 = arith.maximumf %206, %207 : vector<32x256xf32>
    %209 = arith.truncf %208 : vector<32x256xf32> to vector<32x256xbf16>
    %cst_120 = arith.constant dense<0.000000e+00> : vector<32x256xf32>
    %210 = tpu.matmul %2, %209, %cst_120 {dimension_numbers = #tpu.dot_dimension_numbers<[1], [0], [0], [1], [0, 0, 1, 1], [], []>} : vector<32x32xbf16>, vector<32x256xbf16>, vector<32x256xf32> -> vector<32x256xf32>
    %211 = vector.broadcast %3 : vector<32x1xf32> to vector<32x256xf32>
    %212 = arith.addf %210, %211 : vector<32x256xf32>
    %213 = vector.extract_strided_slice %212 {offsets = [0, 0], sizes = [16, 256], strides = [1, 1]} : vector<32x256xf32> to vector<16x256xf32>
    %214 = vector.extract_strided_slice %212 {offsets = [16, 0], sizes = [16, 256], strides = [1, 1]} : vector<32x256xf32> to vector<16x256xf32>
    %cst_121 = arith.constant 0.000000e+00 : f32
    %215 = vector.broadcast %cst_121 : f32 to vector<16x256xf32>
    %216 = arith.maximumf %214, %215 : vector<16x256xf32>
    %217 = vector.broadcast %cst_121 : f32 to vector<16x256xf32>
    %218 = arith.subf %214, %217 : vector<16x256xf32>
    %219 = arith.cmpf one, %218, %218 : vector<16x256xf32>
    %220 = vector.broadcast %cst_121 : f32 to vector<16x256xf32>
    %221 = arith.addf %214, %220 : vector<16x256xf32>
    %222 = math.absf %218 : vector<16x256xf32>
    %cst_122 = arith.constant 0.000000e+00 : f32
    %223 = vector.broadcast %cst_122 : f32 to vector<16x256xf32>
    %224 = arith.subf %223, %222 : vector<16x256xf32>
    %225 = math.exp %224 : vector<16x256xf32>
    %226 = math.log1p %225 : vector<16x256xf32>
    %227 = arith.addf %216, %226 : vector<16x256xf32>
    %228 = arith.select %219, %221, %227 : vector<16x256xi1>, vector<16x256xf32>
    %cst_123 = arith.constant 0.899999976 : f32
    %229 = vector.broadcast %cst_123 : f32 to vector<16x256xf32>
    %230 = arith.mulf %229, %228 : vector<16x256xf32>
    %cst_124 = arith.constant 1.000000e-01 : f32
    %231 = vector.broadcast %cst_124 : f32 to vector<16x256xf32>
    %232 = arith.addf %231, %230 : vector<16x256xf32>
    %c3_125 = arith.constant 3 : index
    %c0_126 = arith.constant 0 : index
    %c0_127 = arith.constant 0 : index
    %233 = vector.load %arg9[%c3_125, %c0_126, %c0_127] : memref<4x16x256xf32, #tpu.memory_space<vmem>>, vector<1x16x256xf32>
    %234 = vector.shape_cast %233 : vector<1x16x256xf32> to vector<16x256xf32>
    %235 = vector.shape_cast %213 : vector<16x256xf32> to vector<1x16x256xf32>
    tpu.vector_store %arg9[%c3_125, %c0_126, %c0_127], %235 {strides = array<i32>} : memref<4x16x256xf32, #tpu.memory_space<vmem>>, vector<1x16x256xf32>,
    %236 = arith.mulf %232, %232 : vector<16x256xf32>
    %c3_128 = arith.constant 3 : index
    %c0_129 = arith.constant 0 : index
    %c0_130 = arith.constant 0 : index
    %237 = vector.load %arg10[%c3_128, %c0_129, %c0_130] : memref<4x16x256xf32, #tpu.memory_space<vmem>>, vector<1x16x256xf32>
    %238 = vector.shape_cast %237 : vector<1x16x256xf32> to vector<16x256xf32>
    %239 = vector.shape_cast %236 : vector<16x256xf32> to vector<1x16x256xf32>
    tpu.vector_store %arg10[%c3_128, %c0_129, %c0_130], %239 {strides = array<i32>} : memref<4x16x256xf32, #tpu.memory_space<vmem>>, vector<1x16x256xf32>,
    return
  }
  func.func @transform_0(%arg0: i32, %arg1: i32) -> (i32, i32, i32) {
    %c0_i32 = arith.constant 0 : i32
    %c0_i32_0 = arith.constant 0 : i32
    return %arg0, %c0_i32, %arg1 : i32, i32, i32
  }
  func.func @transform_1(%arg0: i32, %arg1: i32) -> (i32, i32) {
    %c0_i32 = arith.constant 0 : i32
    %c0_i32_0 = arith.constant 0 : i32
    %c0_i32_1 = arith.constant 0 : i32
    return %c0_i32, %c0_i32_0 : i32, i32
  }
  func.func @transform_2(%arg0: i32, %arg1: i32) -> (i32, i32) {
    %c0_i32 = arith.constant 0 : i32
    %c0_i32_0 = arith.constant 0 : i32
    %c0_i32_1 = arith.constant 0 : i32
    return %c0_i32, %c0_i32_0 : i32, i32
  }
  func.func @transform_3(%arg0: i32, %arg1: i32) -> (i32, i32, i32) {
    %c0_i32 = arith.constant 0 : i32
    %c0_i32_0 = arith.constant 0 : i32
    %c0_i32_1 = arith.constant 0 : i32
    %c0_i32_2 = arith.constant 0 : i32
    return %c0_i32, %c0_i32_0, %c0_i32_1 : i32, i32, i32
  }
  func.func @transform_4(%arg0: i32, %arg1: i32) -> (i32, i32, i32) {
    %c0_i32 = arith.constant 0 : i32
    %c0_i32_0 = arith.constant 0 : i32
    %c0_i32_1 = arith.constant 0 : i32
    %c0_i32_2 = arith.constant 0 : i32
    return %c0_i32, %c0_i32_0, %c0_i32_1 : i32, i32, i32
  }
  func.func @transform_5(%arg0: i32, %arg1: i32) -> (i32, i32) {
    %c0_i32 = arith.constant 0 : i32
    %c0_i32_0 = arith.constant 0 : i32
    %c0_i32_1 = arith.constant 0 : i32
    return %c0_i32, %c0_i32_0 : i32, i32
  }
  func.func @transform_6(%arg0: i32, %arg1: i32) -> (i32, i32) {
    %c0_i32 = arith.constant 0 : i32
    %c0_i32_0 = arith.constant 0 : i32
    %c0_i32_1 = arith.constant 0 : i32
    return %c0_i32, %c0_i32_0 : i32, i32
  }
  func.func @transform_7(%arg0: i32, %arg1: i32) -> (i32, i32, i32) {
    %c0_i32 = arith.constant 0 : i32
    %c0_i32_0 = arith.constant 0 : i32
    return %arg0, %c0_i32, %arg1 : i32, i32, i32
  }
  func.func @transform_8(%arg0: i32, %arg1: i32) -> (i32, i32, i32) {
    %c0_i32 = arith.constant 0 : i32
    %c0_i32_0 = arith.constant 0 : i32
    return %arg0, %c0_i32, %arg1 : i32, i32, i32
  }
}

</mosaic_0001>

<bundles_post_ra>
// kernel: latent_layer_pallas.1
= control target key start
LH: loop header
LB: loop body
LE: loop exit
PB: predicated region body
PF: predicated region fallthrough
CT: control target
= control target key end

     0   :  { %s3682_s0 = inlined_call_operand.hbm [shape: f32[8,16,256], index: 0, kind: input, shape index: {}]   ;;  %s3683_s1 = inlined_call_operand.vmem [shape: bf16[32,16], index: 1, kind: input, shape index: {}]   ;;  %s3684_s2 = inlined_call_operand.vmem [shape: f32[32,1], index: 2, kind: input, shape index: {}]   ;;  %s3685_s3 = inlined_call_operand.vmem [shape: bf16[2,32,32], index: 3, kind: input, shape index: {}]   ;;  %s3686_s4 = inlined_call_operand.vmem [shape: f32[2,32,1], index: 4, kind: input, shape index: {}]   ;;  %s3687_s5 = inlined_call_operand.vmem [shape: bf16[32,32], index: 5, kind: input, shape index: {}]   ;;  %s3688_s6 = inlined_call_operand.vmem [shape: f32[32,1], index: 6, kind: input, shape index: {}]   ;;  %s3689_s7 = inlined_call_operand.hbm [shape: f32[8,16,256], index: 7, kind: output, shape index: {0}]   ;;  %s3690_s8 = inlined_call_operand.hbm [shape: f32[8,16,256], index: 8, kind: output, shape index: {1}]  }
   0x1   :  { %3698 = sst [smem:[#allocation14_spill]] %s3682_s0 }
   0x2   :  { %14 = vsyncpa [#allocation3], 0 }
   0x3   :  { %16 = vsyncpa [#allocation3 + $0x1], 0 }
   0x4   :  { %17 = vsyncpa [#allocation4], 0 }
   0x5   :  { %19 = vsyncpa [#allocation4 + $0x1], 0 }
   0x6   :  { %20 = vsyncpa [#allocation7], 0 }
   0x7   :  { %22 = vsyncpa [#allocation7 + $0x1], 0  ;;  %s2872_s27 = smov 0   ;;  %s2874_s28 = smov 0  }
   0x8   :  { %s2876_s29 = smov 0   ;;  %s2878_s30 = smov 0  }
   0x9   :  { %s2880_s9 = smov 0   ;;  %s2882_s10 = smov 0  }
   0xa LB: > { %s2363_s11 = sadd.s32 4294967295, %s2817_s10   ;;  %s2364_s12 = sadd.s32 4294967294, %s2817_s10   ;;  %s2817_s10 = sphi %s2882_s10, %s28_s10   ;;  %s2813_s9 = sphi %s2880_s9, %s3721_s9   ;;  %s2809_s30 = sphi %s2878_s30, %s3720_s30   ;;  %s2805_s29 = sphi %s2876_s29, %s3719_s29   ;;  %s2801_s28 = sphi %s2874_s28, %s3718_s28   ;;  %s2797_s27 = sphi %s2872_s27, %s3717_s27  }
   0xb   : > { %s40_s13 = sadd.s32 1, %s2813_s9  ;;  %s49_s14 = sadd.s32 1, %s2805_s29 }
   0xc   : > { %p42_p0 = scmp.ge.s32.totalorder %s40_s13, 2  ;;  %p56_p1 = scmp.ne.s32.totalorder %s2805_s29, %s2801_s28 }
   0xd   : > { %p57_p2 = scmp.eq.s32.totalorder %s2817_s10, 0  ;;  %p62_p3 = scmp.ne.s32.totalorder %s2801_s28, %s2797_s27 }
   0xe   : > { %s3723_s13 = smov (%p42_p0, %s40_s13), 0  ;;  %p63_p5 = scmp.eq.s32.totalorder %s2363_s11, 0 }
   0xf   : > { %p2913_p4 = por %p57_p2, %p56_p1  ;;  %s44_s16 = ssub.s32 %s2813_s9, %s3723_s13 }
  0x10   : > { %p214_p6 = scmp.eq.s32.totalorder %s2363_s11, 1  ;;  %p47_p7 = scmp.eq.s32.totalorder %s44_s16, 0 }
  0x11   : > { %p2919_p8 = por %p63_p5, %p62_p3  ;;  %p220_p10 = scmp.eq.s32.totalorder %s2364_s12, 1 }
  0x12   : > { %p2923_p9 = por %p214_p6, %p56_p1  ;;  %p2528_p13 = scmp.lt.s32.totalorder %s2817_s10, 2 }
  0x13   : > { %s2928_s19 = scalar_select %p47_p7, %s2805_s29, %s49_s14  }
  0x14   : > { %s3701_s18 = scalar_select %p2923_p9, 1, 0 }
  0x15   : > { %p2930_p11 = por %p220_p10, %p62_p3  ;;  %s286_s21 = sand.u32 1, %s2805_s29  }
  0x16   : > { %s2367_s22 = sshll.u32 %s286_s21, 7  ;;  %s2506_s23 = sshll.u32 %s2813_s9, 11 }
  0x17   : > { %s3702_s20 = scalar_select %p2930_p11, 1, 0 }
  0x18   : > { %s3703_s0 = sld [smem:[#allocation14_spill]]  ;;  %s290_s11 = scalar_lea.vmem [#allocation2], %s2367_s22 }
  0x19   : > { %s300_s12 = sshll.u32 %s290_s11, 4  ;;  %p2947_p0 = pnand %p2528_p13, %p2913_p4  ;;  %s2943_s12 = int_to_ptr.vmem [resolvable:$true] %s300_s12 }
  0x1a   : > { %s2952_s16 = scalar_lea.sflag [#allocation3], %s286_s21 }
  0x1b   : > { %p2675_p3 = pneg %p2947_p0 }
  0x1e   : > { %s2941_s26 = scalar_lea.hbm %s3703_s0, %s2506_s23  ;;  %s2678_s15 = scalar_lea.hbm %s3703_s0, 4096 }
  0x1f   : > { %s2673_s23 = scalar_lea.hbm %s2941_s26, 2048  ;;  %p2679_p4 = scmp.lt.u32.totalorder %s2941_s26, %s3703_s0 }
  0x20   : > { %p2674_p2 = scmp.ne.s32.totalorder %s2941_s26, %s2673_s23  ;;  %p2680_p7 = scmp.lt.u32.totalorder %s2678_s15, %s2673_s23 }
  0x21   : > { %p2682_p13 = scmp.lt.u32.totalorder %s2673_s23, %s2941_s26 }
  0x22   : > { %p2676_p5 = pnand %p2675_p3, %p2674_p2  ;;  %p2681_p10 = por %p2680_p7, %p2679_p4 }
  0x24   : > { %p2677_p6 = pneg %p2676_p5  ;;  %p2683_p12 = por %p2682_p13, %p2681_p10 }
  0x26   : > { %p2684_p1 = pnand %p2683_p12, %p2677_p6 }
  0x28   : > { %2687 = shalt.err (!%p2684_p1)
}
  0x29   : > { %s2688_s21 = scalar_lea.vmem %s2943_s12, 2048  ;;  %s2819_s22 = smov [#allocation2]  }
  0x2a   : > { %p2689_p2 = scmp.ne.s32.totalorder %s2943_s12, %s2688_s21  ;;  %s2693_s24 = sshll.u32 %s2819_s22, 4  ;;  %s2694_s24 = int_to_ptr.vmem [resolvable:$false] %s2693_s24 }
  0x2b   : > { %s2695_s25 = scalar_lea.vmem %s2694_s24, 4096  ;;  %p2696_p9 = scmp.lt.s32.totalorder %s2943_s12, %s2694_s24 }
  0x2c   : > { %p2691_p5 = pnand %p2689_p2, %p2675_p3  ;;  %p2697_p4 = scmp.lt.s32.totalorder %s2695_s25, %s2688_s21 }
  0x2e   : > { %p2692_p11 = pneg %p2691_p5  ;;  %p2698_p7 = por %p2697_p4, %p2696_p9 }
  0x30   : > { %p2699_p10 = pnand %p2698_p7, %p2692_p11 }
  0x32   : > { %2702 = shalt.err (!%p2699_p10)
}
  0x33   : > { %s2820_s23 = smov 256   ;;  %s2821_s15 = smov 16  }
  0x34   : > { %2520 = dma.hbm_to_vmem [thread:$0]  (!%p2947_p0), %s2941_s26, 2048, %s2943_s12, %s2952_s16, %s2820_s23, %s2820_s23, %s2821_s15  }
  0x35   : > { %p308_p12 = scmp.lt.s32.totalorder %s2817_s10, 3  ;;  %p3705_p1 = scmp.ge.s32.totalorder %s2817_s10, 1 }
  0x37   : > { %p309_p3 = pnand %p3705_p1, %p308_p12 }
  0x39   : > { %312 = sbr.rel (%p309_p3) target bundleno = 2514 (0x9d2), region = 48 }
  0x40   : > { %s2984_s11 = sand.u32 1, %s2801_s28  }
  0x41   : > { %s2987_s21 = sshll.u32 %s2984_s11, 7  ;;  %s315_s22 = scalar_lea.sflag [#allocation3], %s2984_s11 }
  0x42   : > { %s2991_s24 = scalar_lea.vmem [#allocation2], %s2987_s21 }
  0x43   : > { %2784 = dma.done.wait (%p2919_p8), %s315_s22, 2048  }
  0x44   : > { %2786 = vsyncadd (%p2919_p8), %s315_s22, 4294965248  ;;  %v3692_v0 = vmov 0   ;;  %v380_v1 = vld [vmem:[%s2991_s24 + $0x8] sm:$0xff]  ;;  %v382_v2 = vld [vmem:[%s2991_s24 + $0x18] sm:$0xff]  ;;  %vm415_vm0 = vcmask 130048   ;;  %vm525_vm1 = vcmask 261120  }
  0x45   : > { %454 = vmatprep.mubr.bf16.mxu0 %v3692_v0  ;;  %2583 = vset.pattern.permute.xlu0 %v3692_v0  ;;  %v379_v3 = vld [vmem:[%s2991_s24] sm:$0xff]  ;;  %v384_v4 = vpack.c.bf16 %v382_v2, %v380_v1  ;;  %v381_v5 = vld [vmem:[%s2991_s24 + $0x10] sm:$0xff]  ;;  %v368_v10 = vld [vmem:[%s3684_s2 + $0x8] sm:$0xff]  ;;  %s3208_s14 = scalar_lea.vmem [#allocation5], %s2987_s21  ;;  %s3282_s15 = scalar_lea.vmem [#allocation6], %s2987_s21 }
  0x46   : > { %2584 = vset.pattern.permute.xlu1 %v3692_v0  ;;  %564 = vmatprep.mubr.bf16.mxu1 %v3692_v0  ;;  %v383_v6 = vpack.c.bf16 %v381_v5, %v379_v3  ;;  %v3008_v7 = vld [vmem:[%s3683_s1] sm:$0xff]   ;;  %v369_v9 = vld [vmem:[%s3684_s2 + $0x10] sm:$0xff]  ;;  %v370_v11 = vld [vmem:[%s3684_s2 + $0x18] sm:$0xff]  ;;  %s2222_s12 = sshll.u32 %s3208_s14, 4  ;;  %s2201_s23 = scalar_lea.sflag [#allocation4], %s2984_s11  ;;  %s3547_s12 = int_to_ptr.vmem [resolvable:$true] %s2222_s12 }
  0x47   : > { %422 = vmatprep.subr.bf16.mxu0 %v384_v4  ;;  %v367_v8 = vld [vmem:[%s3684_s2] sm:$0xff]  ;;  %397 = vperm.xlu1 %2584, %v369_v9   ;;  %v492_v13 = vld [vmem:[%s3686_s4 + $0x8] sm:$0xff]  ;;  %v493_v15 = vld [vmem:[%s3686_s4 + $0x10] sm:$0xff]  ;;  %s2703_s21 = scalar_lea.vmem %s3547_s12, 2048  ;;  %p3713_p9 = scmp.ne.s32.totalorder %s3701_s18, 0 }
  0x48   : > { %423 = vmatpush1.bf16.msra.mxu0 %v383_v6  ;;  %387 = vperm.xlu0 %2583, %v367_v8   ;;  %v491_v12 = vld [vmem:[%s3686_s4] sm:$0xff]  ;;  %v3034_v14 = vld [vmem:[%s3683_s1 + $0x8] sm:$0xff]   ;;  %v494_v16 = vld [vmem:[%s3686_s4 + $0x18] sm:$0xff]  ;;  %p2704_p8 = scmp.ne.s32.totalorder %s3547_s12, %s2703_s21  ;;  %s2823_s22 = smov [#allocation5]  }
  0x49   : > { %v2387_v17 = vld [vmem:[%s3686_s4 + $0x20] sm:$0xff]  ;;  %v2388_v18 = vld [vmem:[%s3686_s4 + $0x28] sm:$0xff]  ;;  %v2389_v19 = vld [vmem:[%s3686_s4 + $0x30] sm:$0xff]  ;;  %s2707_s17 = sshll.u32 %s2823_s22, 4  ;;  %s2708_s17 = int_to_ptr.vmem [resolvable:$false] %s2707_s17 }
  0x4a   : > { %v2390_v20 = vld [vmem:[%s3686_s4 + $0x38] sm:$0xff]  ;;  %v377_v21 = vld [vmem:[%s3688_s6 + $0x10] sm:$0xff]  ;;  %v375_v23 = vld [vmem:[%s3688_s6] sm:$0xff]  ;;  %p2705_p11 = pnand %p2704_p8, %p3713_p9  ;;  %s2709_s26 = scalar_lea.vmem %s2708_s17, 4096 }
  0x4b   : > { %2377 = vmatmul.mubr.msk.bf16.vlgmr.msra.gmra.mrb[0].mxu0 %vm415_vm0, %v3008_v7  ;;  %402 = vperm.xlu1 %2584, %v370_v11   ;;  %v378_v22 = vld [vmem:[%s3688_s6 + $0x18] sm:$0xff]  ;;  %v376_v24 = vld [vmem:[%s3688_s6 + $0x8] sm:$0xff]  ;;  %v2587_v57 = vld [vmem:[%s3685_s3] sm:$0xff]   ;;  %p2710_p6 = scmp.lt.s32.totalorder %s3547_s12, %s2708_s17  ;;  %p2711_p13 = scmp.lt.s32.totalorder %s2709_s26, %s2703_s21 }
  0x4c   : > { %464 = vmatprep.mubr.bf16.mxu0 %v3692_v0  ;;  %392 = vperm.xlu0 %2583, %v368_v10   ;;  %v2588_v58 = vld [vmem:[%s3685_s3 + $0x8] sm:$0xff]   ;;  %p2706_p0 = pneg %p2705_p11 }
  0x4d   : > { %p2712_p2 = por %p2711_p13, %p2710_p6 }
  0x4f   : > { %502 = vperm.xlu1 %2584, %v492_v13   ;;  %p2713_p5 = pnand %p2712_p2, %p2706_p0 }
  0x50   : > { %497 = vperm.xlu0 %2583, %v491_v12  }
  0x53   : > { %2378 = vmatmul.mubr.msk.bf16.gmra.mrb[4].mxu0 %vm415_vm0, %v3034_v14  ;;  %512 = vperm.xlu1 %2584, %v494_v16  }
  0x54   : > { %507 = vperm.xlu0 %2583, %v493_v15   ;;  %675 = vmatprep.mubr.bf16.mxu0 %v3692_v0 }
  0x57   : > { %614 = vperm.xlu1 %2584, %v2388_v18  }
  0x58   : > { %609 = vperm.xlu0 %2583, %v2387_v17  }
  0x5b   : > { %624 = vperm.xlu1 %2584, %v2390_v20  }
  0x5c   : > { %619 = vperm.xlu0 %2583, %v2389_v19  }
  0x5f   : > { %976 = vperm.xlu1 %2584, %v492_v13  }
  0x60   : > { %971 = vperm.xlu0 %2583, %v491_v12  }
  0x63   : > { %986 = vperm.xlu1 %2584, %v494_v16  }
  0x64   : > { %981 = vperm.xlu0 %2583, %v493_v15  }
  0x67   : > { %1085 = vperm.xlu1 %2584, %v2388_v18  }
  0x68   : > { %1080 = vperm.xlu0 %2583, %v2387_v17  }
  0x6b   : > { %1095 = vperm.xlu1 %2584, %v2390_v20  }
  0x6c   : > { %1090 = vperm.xlu0 %2583, %v2389_v19  }
  0x6f   : > { %1413 = vperm.xlu1 %2584, %v492_v13  }
  0x70   : > { %1408 = vperm.xlu0 %2583, %v491_v12  }
  0x73   : > { %1423 = vperm.xlu1 %2584, %v494_v16  }
  0x74   : > { %1418 = vperm.xlu0 %2583, %v493_v15  }
  0x77   : > { %1522 = vperm.xlu1 %2584, %v2388_v18  }
  0x78   : > { %1517 = vperm.xlu0 %2583, %v2387_v17  }
  0x7b   : > { %1532 = vperm.xlu1 %2584, %v2390_v20  }
  0x7c   : > { %1527 = vperm.xlu0 %2583, %v2389_v19  }
  0x7f   : > { %1850 = vperm.xlu1 %2584, %v492_v13  }
  0x80   : > { %1845 = vperm.xlu0 %2583, %v491_v12  }
  0x83   : > { %1860 = vperm.xlu1 %2584, %v494_v16  }
  0x84   : > { %1855 = vperm.xlu0 %2583, %v493_v15  }
  0x87   : > { %1959 = vperm.xlu1 %2584, %v2388_v18  }
  0x88   : > { %1954 = vperm.xlu0 %2583, %v2387_v17  }
  0x8b   : > { %1969 = vperm.xlu1 %2584, %v2390_v20  }
  0x8c   : > { %1964 = vperm.xlu0 %2583, %v2389_v19  }
  0x8f   : > { %725 = vperm.xlu1 %2584, %v378_v22  }
  0x90   : > { %720 = vperm.xlu0 %2583, %v377_v21  }
  0x93   : > { %715 = vperm.xlu1 %2584, %v376_v24  }
  0x94   : > { %710 = vperm.xlu0 %2583, %v375_v23  }
  0xc6   : > { %v3076_v34 = vpop.permute.xlu1 %397 }
  0xc7   : > { %v3069_v25 = vpop.permute.xlu0 %387 }
  0xca   : > { %v3080_v45 = vpop.permute.xlu1 %402 }
  0xcb   : > { %v3072_v29 = vpop.permute.xlu0 %392 }
  0xce   : > { %v503_v63 = vpop.permute.xlu1 %502 }
  0xcf   : > { %v498_v59 = vpop.permute.xlu0 %497 }
  0xd2   : > { %v513_v18 = vpop.permute.xlu1 %512 }
  0xd3   : > { %v508_v12 = vpop.permute.xlu0 %507 }
 0x11e   : > { %v456_v26 = vpop.f32.mrb[0].mxu0 }
 0x11f   : > { %v457_v27 = vadd.f32 %v456_v26, %v3069_v25  ;;  %v458_v28 = vpop.f32.mrb[1].mxu0 }
 0x120   : > { %v459_v30 = vadd.f32 %v458_v28, %v3069_v25  ;;  %v460_v31 = vpop.f32.mrb[2].mxu0  ;;  %v2402_v28 = vld [vmem:[%s2991_s24 + $0x38] sm:$0xff] }
 0x121   : > { %v461_v32 = vadd.f32 %v460_v31, %v3072_v29  ;;  %v462_v33 = vpop.f32.mrb[3].mxu0  ;;  %v475_v36 = vmax.f32 %v457_v27, 0.0  ;;  %v2400_v27 = vld [vmem:[%s2991_s24 + $0x28] sm:$0xff] }
 0x122   : > { %v463_v35 = vadd.f32 %v462_v33, %v3072_v29  ;;  %v476_v38 = vmax.f32 %v459_v30, 0.0 }
 0x123   : > { %v477_v37 = vmax.f32 %v461_v32, 0.0 }
 0x124   : > { %v478_v39 = vmax.f32 %v463_v35, 0.0  ;;  %v895_v35 = vpack.c.bf16 %v2402_v28, %v2400_v27 }
 0x125   : > { %v487_v40 = vpack.c.bf16 %v477_v37, %v475_v36  ;;  %v2399_v36 = vld [vmem:[%s2991_s24 + $0x20] sm:$0xff]  ;;  %v2401_v37 = vld [vmem:[%s2991_s24 + $0x30] sm:$0xff] }
 0x126   : > { %v466_v41 = vpop.f32.mrb[4].mxu0  ;;  %v488_v42 = vpack.c.bf16 %v478_v39, %v476_v38  ;;  %v2589_v38 = vld [vmem:[%s3685_s3 + $0x10] sm:$0xff]   ;;  %v894_v39 = vpack.c.bf16 %v2401_v37, %v2399_v36  ;;  %v3132_v36 = vld [vmem:[%s3687_s5 + $0x8] sm:$0xff]  }
 0x127   : > { %v467_v43 = vadd.f32 %v466_v41, %v3076_v34  ;;  %v468_v44 = vpop.f32.mrb[5].mxu0  ;;  %v610_v41 = vpop.permute.xlu0 %609 }
 0x128   : > { %v469_v46 = vadd.f32 %v468_v44, %v3076_v34  ;;  %v470_v47 = vpop.f32.mrb[6].mxu0  ;;  %532 = vmatprep.subr.bf16.mxu1 %v488_v42 }
 0x129   : > { %v471_v48 = vadd.f32 %v470_v47, %v3080_v45  ;;  %v472_v49 = vpop.f32.mrb[7].mxu0  ;;  %533 = vmatpush1.bf16.msra.mxu1 %v487_v40  ;;  %v479_v51 = vmax.f32 %v467_v43, 0.0  ;;  %v2590_v40 = vld [vmem:[%s3685_s3 + $0x18] sm:$0xff]  }
 0x12a   : > { %v473_v50 = vadd.f32 %v472_v49, %v3080_v45  ;;  %v480_v53 = vmax.f32 %v469_v46, 0.0  ;;  %v615_v46 = vpop.permute.xlu1 %614 }
 0x12b   : > { %v481_v52 = vmax.f32 %v471_v48, 0.0 }
 0x12c   : > { %v482_v54 = vmax.f32 %v473_v50, 0.0 }
 0x12d   : > { %v489_v55 = vpack.c.bf16 %v481_v52, %v479_v51 }
 0x12e   : > { %v490_v56 = vpack.c.bf16 %v482_v54, %v480_v53 }
 0x130   : > { %534 = vmatprep.subr.bf16.mxu1 %v490_v56 }
 0x131   : > { %535 = vmatpush1.bf16.msra.mxu1 %v489_v55 }
 0x134   : > { %2381 = vmatmul.mubr.msk.bf16.vlgmr.msra.gmra.mrb[0].mxu1 %vm525_vm1, %v2587_v57  ;;  %v620_v57 = vpop.permute.xlu0 %619 }
 0x135   : > { %574 = vmatprep.mubr.bf16.mxu1 %v3692_v0 }
 0x13c   : > { %2382 = vmatmul.mubr.msk.bf16.gmra.mrb[4].mxu1 %vm525_vm1, %v2588_v58 }
 0x13d   : > { %776 = vmatprep.mubr.bf16.mxu1 %v3692_v0 }
 0x207   : > { %v566_v60 = vpop.f32.mrb[0].mxu1 }
 0x208   : > { %v567_v61 = vadd.f32 %v566_v60, %v498_v59  ;;  %v568_v62 = vpop.f32.mrb[1].mxu1 }
 0x209   : > { %v569_v1 = vadd.f32 %v568_v62, %v498_v59  ;;  %v570_v2 = vpop.f32.mrb[2].mxu1  ;;  %v625_v62 = vpop.permute.xlu1 %624 }
 0x20a   : > { %v571_v3 = vadd.f32 %v570_v2, %v503_v63  ;;  %v572_v4 = vpop.f32.mrb[3].mxu1  ;;  %v585_v6 = vmax.f32 %v567_v61, 0.0 }
 0x20b   : > { %v573_v5 = vadd.f32 %v572_v4, %v503_v63  ;;  %v586_v9 = vmax.f32 %v569_v1, 0.0 }
 0x20c   : > { %v587_v8 = vmax.f32 %v571_v3, 0.0 }
 0x20d   : > { %v588_v10 = vmax.f32 %v573_v5, 0.0 }
 0x20e   : > { %v598_v11 = vpack.c.bf16 %v587_v8, %v585_v6 }
 0x20f   : > { %v599_v13 = vpack.c.bf16 %v588_v10, %v586_v9  ;;  %v576_v15 = vpop.f32.mrb[4].mxu1 }
 0x210   : > { %v577_v16 = vadd.f32 %v576_v15, %v508_v12  ;;  %v578_v17 = vpop.f32.mrb[5].mxu1 }
 0x211   : > { %v579_v19 = vadd.f32 %v578_v17, %v508_v12  ;;  %v580_v20 = vpop.f32.mrb[6].mxu1  ;;  %643 = vmatprep.subr.bf16.mxu0 %v599_v13 }
 0x212   : > { %v581_v21 = vadd.f32 %v580_v20, %v513_v18  ;;  %v582_v22 = vpop.f32.mrb[7].mxu1  ;;  %644 = vmatpush1.bf16.msra.mxu0 %v598_v11  ;;  %v589_v24 = vmax.f32 %v577_v16, 0.0 }
 0x213   : > { %v583_v23 = vadd.f32 %v582_v22, %v513_v18  ;;  %v590_v30 = vmax.f32 %v579_v19, 0.0  ;;  %v3120_v18 = vld [vmem:[%s3687_s5] sm:$0xff]  }
 0x214   : > { %v591_v26 = vmax.f32 %v581_v21, 0.0 }
 0x215   : > { %v592_v31 = vmax.f32 %v583_v23, 0.0 }
 0x216   : > { %v600_v32 = vpack.c.bf16 %v591_v26, %v589_v24 }
 0x217   : > { %v601_v33 = vpack.c.bf16 %v592_v31, %v590_v30 }
 0x219   : > { %645 = vmatprep.subr.bf16.mxu0 %v601_v33 }
 0x21a   : > { %646 = vmatpush1.bf16.msra.mxu0 %v600_v32 }
 0x21b   : > { %896 = vmatprep.subr.bf16.mxu0 %v895_v35 }
 0x21d   : > { %2393 = vmatmul.mubr.msk.bf16.vlgmr.msra.gmra.mrb[8].mxu0 %vm525_vm1, %v2589_v38 }
 0x21e   : > { %897 = vmatpush1.bf16.msra.mxu0 %v894_v39  ;;  %685 = vmatprep.mubr.bf16.mxu0 %v3692_v0 }
 0x225   : > { %2394 = vmatmul.mubr.msk.bf16.gmra.mrb[12].mxu0 %vm525_vm1, %v2590_v40 }
 0x226   : > { %928 = vmatprep.mubr.bf16.mxu0 %v3692_v0 }
 0x22d   : > { %2403 = vmatmul.mubr.msk.bf16.vlgmr.msra.gmra.mrb[16].mxu0 %vm415_vm0, %v3008_v7 }
 0x22e   : > { %938 = vmatprep.mubr.bf16.mxu0 %v3692_v0 }
 0x235   : > { %2404 = vmatmul.mubr.msk.bf16.gmra.mrb[20].mxu0 %vm415_vm0, %v3034_v14 }
 0x236   : > { %1146 = vmatprep.mubr.bf16.mxu0 %v3692_v0 }
 0x2f0   : > { %v677_v42 = vpop.f32.mrb[8].mxu0 }
 0x2f1   : > { %v678_v43 = vadd.f32 %v677_v42, %v610_v41  ;;  %v679_v44 = vpop.f32.mrb[9].mxu0 }
 0x2f2   : > { %v680_v47 = vadd.f32 %v679_v44, %v610_v41  ;;  %v681_v48 = vpop.f32.mrb[10].mxu0 }
 0x2f3   : > { %v682_v49 = vadd.f32 %v681_v48, %v615_v46  ;;  %v683_v50 = vpop.f32.mrb[11].mxu0  ;;  %v696_v52 = vmax.f32 %v678_v43, 0.0  ;;  %v2594_v48 = vld [vmem:[%s3685_s3 + $0x8] sm:$0xff]  }
 0x2f4   : > { %v684_v51 = vadd.f32 %v683_v50, %v615_v46  ;;  %v697_v54 = vmax.f32 %v680_v47, 0.0  ;;  %v2593_v47 = vld [vmem:[%s3685_s3] sm:$0xff]   ;;  %v3151_v50 = vpop.permute.xlu1 %976 }
 0x2f5   : > { %v698_v53 = vmax.f32 %v682_v49, 0.0  ;;  %v3149_v49 = vpop.permute.xlu0 %971 }
 0x2f6   : > { %v699_v55 = vmax.f32 %v684_v51, 0.0 }
 0x2f7   : > { %v704_v56 = vpack.c.bf16 %v698_v53, %v696_v52 }
 0x2f8   : > { %v705_v58 = vpack.c.bf16 %v699_v55, %v697_v54  ;;  %v687_v59 = vpop.f32.mrb[12].mxu0  ;;  %v3155_v52 = vpop.permute.xlu1 %986 }
 0x2f9   : > { %v688_v60 = vadd.f32 %v687_v59, %v620_v57  ;;  %v689_v61 = vpop.f32.mrb[13].mxu0  ;;  %v3153_v51 = vpop.permute.xlu0 %981 }
 0x2fa   : > { %v690_v63 = vadd.f32 %v689_v61, %v620_v57  ;;  %v691_v1 = vpop.f32.mrb[14].mxu0  ;;  %744 = vmatprep.subr.bf16.mxu1 %v705_v58 }
 0x2fb   : > { %v692_v2 = vadd.f32 %v691_v1, %v625_v62  ;;  %v693_v3 = vpop.f32.mrb[15].mxu0  ;;  %745 = vmatpush1.bf16.msra.mxu1 %v704_v56  ;;  %v700_v5 = vmax.f32 %v688_v60, 0.0 }
 0x2fc   : > { %v694_v4 = vadd.f32 %v693_v3, %v625_v62  ;;  %v701_v8 = vmax.f32 %v690_v63, 0.0  ;;  %v3159_v54 = vpop.permute.xlu1 %1085 }
 0x2fd   : > { %v702_v6 = vmax.f32 %v692_v2, 0.0  ;;  %v3157_v53 = vpop.permute.xlu0 %1080 }
 0x2fe   : > { %v703_v9 = vmax.f32 %v694_v4, 0.0 }
 0x2ff   : > { %v706_v10 = vpack.c.bf16 %v702_v6, %v700_v5 }
 0x300   : > { %v707_v11 = vpack.c.bf16 %v703_v9, %v701_v8  ;;  %v930_v12 = vpop.f32.mrb[16].mxu0  ;;  %v3163_v56 = vpop.permute.xlu1 %1095 }
 0x301   : > { %v931_v13 = vadd.f32 %v930_v12, %v3069_v25  ;;  %v932_v15 = vpop.f32.mrb[17].mxu0  ;;  %v3161_v55 = vpop.permute.xlu0 %1090 }
 0x302   : > { %v933_v16 = vadd.f32 %v932_v15, %v3069_v25  ;;  %746 = vmatprep.subr.bf16.mxu1 %v707_v11  ;;  %v934_v17 = vpop.f32.mrb[18].mxu0 }
 0x303   : > { %v935_v19 = vadd.f32 %v934_v17, %v3072_v29  ;;  %747 = vmatpush1.bf16.msra.mxu1 %v706_v10  ;;  %v936_v20 = vpop.f32.mrb[19].mxu0  ;;  %v949_v22 = vmax.f32 %v931_v13, 0.0 }
 0x304   : > { %v937_v21 = vadd.f32 %v936_v20, %v3072_v29  ;;  %v950_v24 = vmax.f32 %v933_v16, 0.0  ;;  %v3167_v58 = vpop.permute.xlu1 %1413 }
 0x305   : > { %v951_v23 = vmax.f32 %v935_v19, 0.0  ;;  %v3165_v57 = vpop.permute.xlu0 %1408 }
 0x306   : > { %v952_v26 = vmax.f32 %v937_v21, 0.0  ;;  %2397 = vmatmul.mubr.msk.bf16.vlgmr.msra.gmra.mrb[8].mxu1 %vm525_vm1, %v3120_v18 }
 0x307   : > { %v961_v27 = vpack.c.bf16 %v951_v23, %v949_v22  ;;  %786 = vmatprep.mubr.bf16.mxu1 %v3692_v0 }
 0x308   : > { %v962_v28 = vpack.c.bf16 %v952_v26, %v950_v24  ;;  %v940_v30 = vpop.f32.mrb[20].mxu0  ;;  %v3171_v60 = vpop.permute.xlu1 %1423 }
 0x309   : > { %v941_v31 = vadd.f32 %v940_v30, %v3076_v34  ;;  %v942_v32 = vpop.f32.mrb[21].mxu0  ;;  %v3169_v59 = vpop.permute.xlu0 %1418 }
 0x30a   : > { %v943_v33 = vadd.f32 %v942_v32, %v3076_v34  ;;  %v944_v35 = vpop.f32.mrb[22].mxu0  ;;  %1005 = vmatprep.subr.bf16.mxu1 %v962_v28 }
 0x30b   : > { %v945_v37 = vadd.f32 %v944_v35, %v3080_v45  ;;  %v946_v38 = vpop.f32.mrb[23].mxu0  ;;  %1006 = vmatpush1.bf16.msra.mxu1 %v961_v27  ;;  %v953_v40 = vmax.f32 %v941_v31, 0.0 }
 0x30c   : > { %v947_v39 = vadd.f32 %v946_v38, %v3080_v45  ;;  %v954_v42 = vmax.f32 %v943_v33, 0.0  ;;  %v3175_v62 = vpop.permute.xlu1 %1522 }
 0x30d   : > { %v955_v41 = vmax.f32 %v945_v37, 0.0  ;;  %v3173_v61 = vpop.permute.xlu0 %1517 }
 0x30e   : > { %v956_v43 = vmax.f32 %v947_v39, 0.0  ;;  %2398 = vmatmul.mubr.msk.bf16.gmra.mrb[12].mxu1 %vm525_vm1, %v3132_v36 }
 0x30f   : > { %v963_v44 = vpack.c.bf16 %v955_v41, %v953_v40  ;;  %1037 = vmatprep.mubr.bf16.mxu1 %v3692_v0 }
 0x310   : > { %v964_v46 = vpack.c.bf16 %v956_v43, %v954_v42  ;;  %v3179_v1 = vpop.permute.xlu1 %1532 }
 0x311   : > { %v3177_v63 = vpop.permute.xlu0 %1527 }
 0x312   : > { %1007 = vmatprep.subr.bf16.mxu1 %v964_v46 }
 0x313   : > { %1008 = vmatpush1.bf16.msra.mxu1 %v963_v44 }
 0x314   : > { %v3183_v3 = vpop.permute.xlu1 %1850 }
 0x315   : > { %v3181_v2 = vpop.permute.xlu0 %1845 }
 0x316   : > { %2407 = vmatmul.mubr.msk.bf16.vlgmr.msra.gmra.mrb[16].mxu1 %vm525_vm1, %v2593_v47 }
 0x317   : > { %1047 = vmatprep.mubr.bf16.mxu1 %v3692_v0 }
 0x318   : > { %v3187_v5 = vpop.permute.xlu1 %1860 }
 0x319   : > { %v3185_v4 = vpop.permute.xlu0 %1855 }
 0x31c   : > { %v3191_v8 = vpop.permute.xlu1 %1959 }
 0x31d   : > { %v3189_v6 = vpop.permute.xlu0 %1954  ;;  %3706 = vst [vmem:[#allocation11_spill] sm:$0xff] %v3191_v8 }
 0x31e   : > { %2408 = vmatmul.mubr.msk.bf16.gmra.mrb[20].mxu1 %vm525_vm1, %v2594_v48 }
 0x31f   : > { %1211 = vmatprep.mubr.bf16.mxu1 %v3692_v0 }
 0x320   : > { %v3195_v10 = vpop.permute.xlu1 %1969 }
 0x321   : > { %v3193_v9 = vpop.permute.xlu0 %1964  ;;  %3708 = vst [vmem:[#allocation13_spill] sm:$0xff] %v3195_v10 }
 0x322   : > { %3707 = vst [vmem:[#allocation12_spill] sm:$0xff] %v3193_v9 }
 0x324   : > { %v3199_v12 = vpop.permute.xlu1 %725 }
 0x325   : > { %v3197_v11 = vpop.permute.xlu0 %720 }
 0x328   : > { %v3204_v19 = vpop.permute.xlu1 %715 }
 0x329   : > { %v3201_v13 = vpop.permute.xlu0 %710 }
 0x3d9   : > { %v778_v15 = vpop.f32.mrb[8].mxu1 }
 0x3da   : > { %v779_v16 = vadd.f32 %v778_v15, %v3201_v13  ;;  %v780_v17 = vpop.f32.mrb[9].mxu1 }
 0x3db   : > { %v781_v20 = vadd.f32 %v780_v17, %v3201_v13  ;;  %v782_v21 = vpop.f32.mrb[10].mxu1 }
 0x3dc   : > { %877 = vst [vmem:[%s3208_s14] sm:$0xff] %v779_v16  ;;  %v783_v22 = vadd.f32 %v782_v21, %v3204_v19  ;;  %v784_v23 = vpop.f32.mrb[11].mxu1 }
 0x3dd   : > { %878 = vst [vmem:[%s3208_s14 + $0x8] sm:$0xff] %v781_v20  ;;  %v785_v24 = vadd.f32 %v784_v23, %v3204_v19 }
 0x3de   : > { %879 = vst [vmem:[%s3208_s14 + $0x10] sm:$0xff] %v783_v22 }
 0x3df   : > { %880 = vst [vmem:[%s3208_s14 + $0x18] sm:$0xff] %v785_v24 }
 0x3e1   : > { %v788_v26 = vpop.f32.mrb[12].mxu1 }
 0x3e2   : > { %v3217_v27 = vadd.f32 %v788_v26, %v3197_v11  ;;  %v790_v28 = vpop.f32.mrb[13].mxu1 }
 0x3e3   : > { %v3220_v30 = vadd.f32 %v790_v28, %v3197_v11  ;;  %v792_v31 = vpop.f32.mrb[14].mxu1 }
 0x3e4   : > { %v809_v32 = vand.u32 2147483647, %v3217_v27  ;;  %v3224_v33 = vadd.f32 %v792_v31, %v3199_v12  ;;  %v794_v35 = vpop.f32.mrb[15].mxu1  ;;  %vm801_vm2 = vcmp.ne.f32.partialorder %v3217_v27, %v3217_v27 }
 0x3e5   : > { %v810_v37 = vand.u32 2147483647, %v3220_v30  ;;  %v3228_v38 = vadd.f32 %v794_v35, %v3199_v12  ;;  %vm802_vm3 = vcmp.ne.f32.partialorder %v3220_v30, %v3220_v30 }
 0x3e6   : > { %v813_v39 = vsub.f32 0.0, %v809_v32  ;;  %v811_v40 = vand.u32 2147483647, %v3224_v33  ;;  %vm803_vm8 = vcmp.ne.f32.partialorder %v3224_v33, %v3224_v33 }
 0x3e7   : > { %v814_v41 = vsub.f32 0.0, %v810_v37  ;;  %v812_v42 = vand.u32 2147483647, %v3228_v38  ;;  %vm804_vm9 = vcmp.ne.f32.partialorder %v3228_v38, %v3228_v38 }
 0x3e8   : > { %v817_v43 = vmul.f32 1.442695, %v813_v39  ;;  %v815_v44 = vsub.f32 0.0, %v811_v40 }
 0x3e9   : > { %v819_v46 = vmul.f32 1.442695, %v814_v41  ;;  %v816_v47 = vsub.f32 0.0, %v812_v42  ;;  %v1039_v48 = vpop.f32.mrb[16].mxu1 }
 0x3ea   : > { %2605 = vpow2.f32 %v817_v43  ;;  %v821_v15 = vmul.f32 1.442695, %v815_v44  ;;  %v1040_v16 = vadd.f32 %v1039_v48, %v3149_v49  ;;  %v1041_v17 = vpop.f32.mrb[17].mxu1 }
 0x3eb   : > { %2607 = vpow2.f32 %v819_v46  ;;  %v823_v20 = vmul.f32 1.442695, %v816_v47  ;;  %v1042_v21 = vadd.f32 %v1041_v17, %v3149_v49  ;;  %v1043_v22 = vpop.f32.mrb[18].mxu1 }
 0x3ec   : > { %2609 = vpow2.f32 %v821_v15  ;;  %v1044_v23 = vadd.f32 %v1043_v22, %v3151_v50  ;;  %v1045_v24 = vpop.f32.mrb[19].mxu1  ;;  %v1058_v28 = vmax.f32 %v1040_v16, 0.0 }
 0x3ed   : > { %2611 = vpow2.f32 %v823_v20  ;;  %v1046_v26 = vadd.f32 %v1045_v24, %v3151_v50  ;;  %v1059_v32 = vmax.f32 %v1042_v21, 0.0 }
 0x3ee   : > { %v1060_v31 = vmax.f32 %v1044_v23, 0.0 }
 0x3ef   : > { %v1061_v35 = vmax.f32 %v1046_v26, 0.0 }
 0x3f0   : > { %v1070_v37 = vpack.c.bf16 %v1060_v31, %v1058_v28 }
 0x3f1   : > { %v1071_v39 = vpack.c.bf16 %v1061_v35, %v1059_v32  ;;  %v1049_v40 = vpop.f32.mrb[20].mxu1  ;;  %v2432_v35 = vld [vmem:[%s2991_s24 + $0x48] sm:$0xff] }
 0x3f2   : > { %v1051_v41 = vpop.f32.mrb[21].mxu1  ;;  %v1050_v48 = vadd.f32 %v1049_v40, %v3153_v51 }
 0x3f3   : > { %v1053_v42 = vpop.f32.mrb[22].mxu1  ;;  %1114 = vmatprep.subr.bf16.mxu0 %v1071_v39  ;;  %v1052_v23 = vadd.f32 %v1051_v41, %v3153_v51 }
 0x3f4   : > { %v2606_v43 = vpop.eup %2605  ;;  %v1054_v49 = vadd.f32 %v1053_v42, %v3155_v52  ;;  %v1055_v44 = vpop.f32.mrb[23].mxu1  ;;  %1115 = vmatpush1.bf16.msra.mxu0 %v1070_v37  ;;  %v1062_v22 = vmax.f32 %v1050_v48, 0.0  ;;  %v2434_v37 = vld [vmem:[%s2991_s24 + $0x58] sm:$0xff]  ;;  %v2431_v42 = vld [vmem:[%s2991_s24 + $0x40] sm:$0xff] }
 0x3f5   : > { %v2608_v46 = vpop.eup %2607  ;;  %v825_v47 = vadd.f32 1.0, %v2606_v43  ;;  %v828_v24 = vmul.f32 -0.5, %v2606_v43  ;;  %v1056_v31 = vadd.f32 %v1055_v44, %v3155_v52  ;;  %v1063_v39 = vmax.f32 %v1052_v23, 0.0  ;;  %v2595_v23 = vld [vmem:[%s3685_s3 + $0x10] sm:$0xff]  }
 0x3f6   : > { %v2610_v50 = vpop.eup %2609  ;;  %v834_v15 = vadd.f32 1.0, %v2608_v46  ;;  %v1064_v20 = vmax.f32 %v1054_v49, 0.0  ;;  %v837_v26 = vmul.f32 -0.5, %v2608_v46  ;;  %v2433_v49 = vld [vmem:[%s2991_s24 + $0x50] sm:$0xff]  ;;  %v1332_v51 = vpack.c.bf16 %v2434_v37, %v2432_v35 }
 0x3f7   : > { %v3238_v16 = vpop.eup %2611  ;;  %2613 = vlog2.f32 %v825_v47  ;;  %v843_v17 = vadd.f32 1.0, %v2610_v50  ;;  %v846_v32 = vmul.f32 -0.5, %v2610_v50  ;;  %v1065_v40 = vmax.f32 %v1056_v31, 0.0 }
 0x3f8   : > { %2615 = vlog2.f32 %v834_v15  ;;  %v852_v21 = vadd.f32 1.0, %v3238_v16  ;;  %v1072_v28 = vpack.c.bf16 %v1064_v20, %v1062_v22  ;;  %v829_v47 = vadd.f32 1.0, %v828_v24 }
 0x3f9   : > { %2617 = vlog2.f32 %v843_v17  ;;  %v855_v15 = vmul.f32 -0.5, %v3238_v16  ;;  %v831_v17 = vand.u32 2147483647, %v2606_v43  ;;  %v838_v48 = vadd.f32 1.0, %v837_v26 }
 0x3fa   : > { %2619 = vlog2.f32 %v852_v21  ;;  %v1073_v0 = vpack.c.bf16 %v1065_v40, %v1063_v39  ;;  %v840_v41 = vand.u32 2147483647, %v2608_v46  ;;  %v847_v10 = vadd.f32 1.0, %v846_v32 }
 0x3fb   : > { %v1331_v21 = vpack.c.bf16 %v2433_v49, %v2431_v42  ;;  %v797_v52 = vmax.f32 %v3217_v27, 0.0  ;;  %v798_v44 = vmax.f32 %v3220_v30, 0.0  ;;  %v849_v22 = vand.u32 2147483647, %v2610_v50 }
 0x3fc   : > { %1116 = vmatprep.subr.bf16.mxu0 %v1073_v0  ;;  %v830_v31 = vmul.f32 %v2606_v43, %v829_v47  ;;  %v856_v32 = vadd.f32 1.0, %v855_v15  ;;  %vm832_vm4 = vcmp.lt.f32.partialorder %v831_v17, 0.0004427343  ;;  %v839_v39 = vmul.f32 %v2608_v46, %v838_v48 }
 0x3fd   : > { %1117 = vmatpush1.bf16.msra.mxu0 %v1072_v28  ;;  %v858_v40 = vand.u32 2147483647, %v3238_v16  ;;  %vm841_vm5 = vcmp.lt.f32.partialorder %v840_v41, 0.0004427343  ;;  %v848_v49 = vmul.f32 %v2610_v50, %v847_v10  ;;  %v799_v43 = vmax.f32 %v3224_v33, 0.0 }
 0x3fe   : > { %1333 = vmatprep.subr.bf16.mxu0 %v1332_v51  ;;  %vm850_vm6 = vcmp.lt.f32.partialorder %v849_v22, 0.0004427343  ;;  %v857_v46 = vmul.f32 %v3238_v16, %v856_v32  ;;  %v3709_v17 = vmov 0   ;;  %v800_v48 = vmax.f32 %v3228_v38, 0.0 }
 0x3ff   : > { %vm859_vm7 = vcmp.lt.f32.partialorder %v858_v40, 0.0004427343 }
 0x400   : > { %2419 = vmatmul.mubr.msk.bf16.vlgmr.msra.gmra.mrb[24].mxu0 %vm525_vm1, %v2595_v23 }
 0x401   : > { %v2614_v20 = vpop.eup %2613  ;;  %1334 = vmatpush1.bf16.msra.mxu0 %v1331_v21  ;;  %1156 = vmatprep.mubr.bf16.mxu0 %v3709_v17 }
 0x402   : > { %v2616_v24 = vpop.eup %2615  ;;  %v827_v26 = vmul.f32 0.6931472, %v2614_v20 }
 0x403   : > { %v2618_v35 = vpop.eup %2617  ;;  %v836_v37 = vmul.f32 0.6931472, %v2616_v24 }
 0x404   : > { %v833_v0 = vsel %vm832_vm4, %v830_v31, %v827_v26  ;;  %v845_v42 = vmul.f32 0.6931472, %v2618_v35  ;;  %v2620_v9 = vpop.eup %2619 }
 0x405   : > { %v861_v8 = vadd.f32 %v833_v0, %v797_v52  ;;  %v842_v20 = vsel %vm841_vm5, %v839_v39, %v836_v37  ;;  %v854_v15 = vmul.f32 0.6931472, %v2620_v9 }
 0x406   : > { %v862_v28 = vadd.f32 %v842_v20, %v798_v44  ;;  %v851_v47 = vsel %vm850_vm6, %v848_v49, %v845_v42 }
 0x407   : > { %v865_v10 = vsel %vm801_vm2, %v3217_v27, %v861_v8  ;;  %v863_v50 = vadd.f32 %v851_v47, %v799_v43  ;;  %v860_v16 = vsel %vm859_vm7, %v857_v46, %v854_v15  ;;  %v2596_v8 = vld [vmem:[%s3685_s3 + $0x18] sm:$0xff]  }
 0x408   : > { %v869_v51 = vmul.f32 0.9, %v865_v10  ;;  %v866_v9 = vsel %vm802_vm3, %v3220_v30, %v862_v28  ;;  %v864_v52 = vadd.f32 %v860_v16, %v800_v48  ;;  %2420 = vmatmul.mubr.msk.bf16.gmra.mrb[28].mxu0 %vm525_vm1, %v2596_v8 }
 0x409   : > { %v870_v41 = vmul.f32 0.9, %v866_v9  ;;  %v867_v21 = vsel %vm803_vm8, %v3224_v33, %v863_v50  ;;  %1365 = vmatprep.mubr.bf16.mxu0 %v3709_v17 }
 0x40a   : > { %v873_v27 = vadd.f32 0.1, %v869_v51  ;;  %v871_v44 = vmul.f32 0.9, %v867_v21  ;;  %v868_v30 = vsel %vm804_vm9, %v3228_v38, %v864_v52 }
 0x40b   : > { %v874_v22 = vadd.f32 0.1, %v870_v41  ;;  %v872_v26 = vmul.f32 0.9, %v868_v30 }
 0x40c   : > { %v881_v23 = vmul.f32 %v873_v27, %v873_v27  ;;  %v875_v24 = vadd.f32 0.1, %v871_v44 }
 0x40d   : > { %v882_v31 = vmul.f32 %v874_v22, %v874_v22  ;;  %v876_v32 = vadd.f32 0.1, %v872_v26 }
 0x40e   : > { %885 = vst [vmem:[%s3282_s15] sm:$0xff] %v881_v23  ;;  %v883_v33 = vmul.f32 %v875_v24, %v875_v24 }
 0x40f   : > { %886 = vst [vmem:[%s3282_s15 + $0x8] sm:$0xff] %v882_v31  ;;  %v884_v38 = vmul.f32 %v876_v32, %v876_v32 }
 0x410   : > { %887 = vst [vmem:[%s3282_s15 + $0x10] sm:$0xff] %v883_v33  ;;  %2435 = vmatmul.mubr.msk.bf16.vlgmr.msra.gmra.mrb[32].mxu0 %vm415_vm0, %v3008_v7 }
 0x411   : > { %888 = vst [vmem:[%s3282_s15 + $0x18] sm:$0xff] %v884_v38  ;;  %1375 = vmatprep.mubr.bf16.mxu0 %v3709_v17 }
 0x418   : > { %2436 = vmatmul.mubr.msk.bf16.gmra.mrb[36].mxu0 %vm415_vm0, %v3034_v14 }
 0x419   : > { %1583 = vmatprep.mubr.bf16.mxu0 %v3709_v17 }
 0x4d3   : > { %v1148_v35 = vpop.f32.mrb[24].mxu0 }
 0x4d4   : > { %v1149_v37 = vadd.f32 %v1148_v35, %v3157_v53  ;;  %v1150_v39 = vpop.f32.mrb[25].mxu0 }
 0x4d5   : > { %v1151_v40 = vadd.f32 %v1150_v39, %v3157_v53  ;;  %v1152_v0 = vpop.f32.mrb[26].mxu0 }
 0x4d6   : > { %v1153_v42 = vadd.f32 %v1152_v0, %v3159_v54  ;;  %v1154_v49 = vpop.f32.mrb[27].mxu0  ;;  %v1167_v7 = vmax.f32 %v1149_v37, 0.0 }
 0x4d7   : > { %v1155_v20 = vadd.f32 %v1154_v49, %v3159_v54  ;;  %v1168_v28 = vmax.f32 %v1151_v40, 0.0 }
 0x4d8   : > { %v1169_v43 = vmax.f32 %v1153_v42, 0.0 }
 0x4d9   : > { %v1170_v47 = vmax.f32 %v1155_v20, 0.0 }
 0x4da   : > { %v1175_v15 = vpack.c.bf16 %v1169_v43, %v1167_v7 }
 0x4db   : > { %v1176_v14 = vpack.c.bf16 %v1170_v47, %v1168_v28  ;;  %v1158_v46 = vpop.f32.mrb[28].mxu0 }
 0x4dc   : > { %v1159_v10 = vadd.f32 %v1158_v46, %v3161_v55  ;;  %v1160_v50 = vpop.f32.mrb[29].mxu0 }
 0x4dd   : > { %v1161_v48 = vadd.f32 %v1160_v50, %v3161_v55  ;;  %v1162_v51 = vpop.f32.mrb[30].mxu0  ;;  %1179 = vmatprep.subr.bf16.mxu1 %v1176_v14  ;;  %v2598_v50 = vld [vmem:[%s3685_s3 + $0x8] sm:$0xff]  }
 0x4de   : > { %v1163_v53 = vadd.f32 %v1162_v51, %v3163_v56  ;;  %v1164_v9 = vpop.f32.mrb[31].mxu0  ;;  %1180 = vmatpush1.bf16.msra.mxu1 %v1175_v15  ;;  %v1171_v16 = vmax.f32 %v1159_v10, 0.0  ;;  %v2597_v10 = vld [vmem:[%s3685_s3] sm:$0xff]  }
 0x4df   : > { %v1165_v54 = vadd.f32 %v1164_v9, %v3163_v56  ;;  %v1172_v21 = vmax.f32 %v1161_v48, 0.0 }
 0x4e0   : > { %v1173_v41 = vmax.f32 %v1163_v53, 0.0 }
 0x4e1   : > { %v1174_v52 = vmax.f32 %v1165_v54, 0.0 }
 0x4e2   : > { %v1177_v8 = vpack.c.bf16 %v1173_v41, %v1171_v16 }
 0x4e3   : > { %v1178_v27 = vpack.c.bf16 %v1174_v52, %v1172_v21  ;;  %v1367_v44 = vpop.f32.mrb[32].mxu0 }
 0x4e4   : > { %v1368_v22 = vadd.f32 %v1367_v44, %v3069_v25  ;;  %v1369_v30 = vpop.f32.mrb[33].mxu0 }
 0x4e5   : > { %v1370_v55 = vadd.f32 %v1369_v30, %v3069_v25  ;;  %1181 = vmatprep.subr.bf16.mxu1 %v1178_v27  ;;  %v1371_v23 = vpop.f32.mrb[34].mxu0 }
 0x4e6   : > { %v1372_v24 = vadd.f32 %v1371_v23, %v3072_v29  ;;  %1182 = vmatpush1.bf16.msra.mxu1 %v1177_v8  ;;  %v1373_v26 = vpop.f32.mrb[35].mxu0  ;;  %v1386_v31 = vmax.f32 %v1368_v22, 0.0 }
 0x4e7   : > { %v1374_v56 = vadd.f32 %v1373_v26, %v3072_v29  ;;  %v1387_v32 = vmax.f32 %v1370_v55, 0.0 }
 0x4e8   : > { %v1388_v33 = vmax.f32 %v1372_v24, 0.0 }
 0x4e9   : > { %v1389_v38 = vmax.f32 %v1374_v56, 0.0  ;;  %2421 = vmatmul.mubr.msk.bf16.vlgmr.msra.gmra.mrb[24].mxu1 %vm525_vm1, %v3120_v18 }
 0x4ea   : > { %v1398_v35 = vpack.c.bf16 %v1388_v33, %v1386_v31  ;;  %1221 = vmatprep.mubr.bf16.mxu1 %v3709_v17 }
 0x4eb   : > { %v1399_v37 = vpack.c.bf16 %v1389_v38, %v1387_v32  ;;  %v1377_v39 = vpop.f32.mrb[36].mxu0 }
 0x4ec   : > { %v1378_v40 = vadd.f32 %v1377_v39, %v3076_v34  ;;  %v1379_v0 = vpop.f32.mrb[37].mxu0 }
 0x4ed   : > { %v1380_v42 = vadd.f32 %v1379_v0, %v3076_v34  ;;  %v1381_v49 = vpop.f32.mrb[38].mxu0  ;;  %1442 = vmatprep.subr.bf16.mxu1 %v1399_v37 }
 0x4ee   : > { %v1382_v20 = vadd.f32 %v1381_v49, %v3080_v45  ;;  %v1383_v7 = vpop.f32.mrb[39].mxu0  ;;  %1443 = vmatpush1.bf16.msra.mxu1 %v1398_v35  ;;  %v1390_v28 = vmax.f32 %v1378_v40, 0.0 }
 0x4ef   : > { %v1384_v43 = vadd.f32 %v1383_v7, %v3080_v45  ;;  %v1391_v47 = vmax.f32 %v1380_v42, 0.0 }
 0x4f0   : > { %v1392_v18 = vmax.f32 %v1382_v20, 0.0 }
 0x4f1   : > { %v1393_v15 = vmax.f32 %v1384_v43, 0.0  ;;  %2422 = vmatmul.mubr.msk.bf16.gmra.mrb[28].mxu1 %vm525_vm1, %v3132_v36 }
 0x4f2   : > { %v1400_v14 = vpack.c.bf16 %v1392_v18, %v1390_v28  ;;  %1474 = vmatprep.mubr.bf16.mxu1 %v3709_v17 }
 0x4f3   : > { %v1401_v46 = vpack.c.bf16 %v1393_v15, %v1391_v47 }
 0x4f5   : > { %1444 = vmatprep.subr.bf16.mxu1 %v1401_v46 }
 0x4f6   : > { %1445 = vmatpush1.bf16.msra.mxu1 %v1400_v14 }
 0x4f9   : > { %2439 = vmatmul.mubr.msk.bf16.vlgmr.msra.gmra.mrb[32].mxu1 %vm525_vm1, %v2597_v10 }
 0x4fa   : > { %1484 = vmatprep.mubr.bf16.mxu1 %v3709_v17 }
 0x501   : > { %2440 = vmatmul.mubr.msk.bf16.gmra.mrb[36].mxu1 %vm525_vm1, %v2598_v50 }
 0x502   : > { %1648 = vmatprep.mubr.bf16.mxu1 %v3709_v17 }
 0x5bc   : > { %v1213_v48 = vpop.f32.mrb[24].mxu1 }
 0x5bd   : > { %v1214_v51 = vadd.f32 %v1213_v48, %v3201_v13  ;;  %v1215_v53 = vpop.f32.mrb[25].mxu1 }
 0x5be   : > { %v1216_v9 = vadd.f32 %v1215_v53, %v3201_v13  ;;  %v1217_v54 = vpop.f32.mrb[26].mxu1 }
 0x5bf   : > { %2423 = vst [vmem:[%s3208_s14 + $0x20] sm:$0xff] %v1214_v51  ;;  %v1218_v16 = vadd.f32 %v1217_v54, %v3204_v19  ;;  %v1219_v41 = vpop.f32.mrb[27].mxu1 }
 0x5c0   : > { %2424 = vst [vmem:[%s3208_s14 + $0x28] sm:$0xff] %v1216_v9  ;;  %v1220_v21 = vadd.f32 %v1219_v41, %v3204_v19 }
 0x5c1   : > { %2425 = vst [vmem:[%s3208_s14 + $0x30] sm:$0xff] %v1218_v16 }
 0x5c2   : > { %2426 = vst [vmem:[%s3208_s14 + $0x38] sm:$0xff] %v1220_v21 }
 0x5c4   : > { %v1223_v52 = vpop.f32.mrb[28].mxu1 }
 0x5c5   : > { %v3336_v8 = vadd.f32 %v1223_v52, %v3197_v11  ;;  %v1225_v27 = vpop.f32.mrb[29].mxu1 }
 0x5c6   : > { %v3339_v44 = vadd.f32 %v1225_v27, %v3197_v11  ;;  %v1227_v22 = vpop.f32.mrb[30].mxu1 }
 0x5c7   : > { %v1244_v30 = vand.u32 2147483647, %v3336_v8  ;;  %v3343_v55 = vadd.f32 %v1227_v22, %v3199_v12  ;;  %v1229_v23 = vpop.f32.mrb[31].mxu1  ;;  %vm1236_vm10 = vcmp.ne.f32.partialorder %v3336_v8, %v3336_v8 }
 0x5c8   : > { %v1245_v24 = vand.u32 2147483647, %v3339_v44  ;;  %v3347_v26 = vadd.f32 %v1229_v23, %v3199_v12  ;;  %vm1237_vm11 = vcmp.ne.f32.partialorder %v3339_v44, %v3339_v44 }
 0x5c9   : > { %v1248_v56 = vsub.f32 0.0, %v1244_v30  ;;  %v1246_v31 = vand.u32 2147483647, %v3343_v55  ;;  %vm1238_vm2 = vcmp.ne.f32.partialorder %v3343_v55, %v3343_v55 }
 0x5ca   : > { %v1249_v33 = vsub.f32 0.0, %v1245_v24  ;;  %v1247_v32 = vand.u32 2147483647, %v3347_v26  ;;  %vm1239_vm3 = vcmp.ne.f32.partialorder %v3347_v26, %v3347_v26 }
 0x5cb   : > { %v1252_v38 = vmul.f32 1.442695, %v1248_v56  ;;  %v1250_v35 = vsub.f32 0.0, %v1246_v31 }
 0x5cc   : > { %v1254_v37 = vmul.f32 1.442695, %v1249_v33  ;;  %v1251_v39 = vsub.f32 0.0, %v1247_v32  ;;  %v1476_v40 = vpop.f32.mrb[32].mxu1 }
 0x5cd   : > { %2621 = vpow2.f32 %v1252_v38  ;;  %v1256_v0 = vmul.f32 1.442695, %v1250_v35  ;;  %v1477_v42 = vadd.f32 %v1476_v40, %v3165_v57  ;;  %v1478_v49 = vpop.f32.mrb[33].mxu1  ;;  %v2466_v40 = vld [vmem:[%s2991_s24 + $0x78] sm:$0xff] }
 0x5ce   : > { %2623 = vpow2.f32 %v1254_v37  ;;  %v1258_v20 = vmul.f32 1.442695, %v1251_v39  ;;  %v1479_v7 = vadd.f32 %v1478_v49, %v3165_v57  ;;  %v1480_v43 = vpop.f32.mrb[34].mxu1  ;;  %v2464_v39 = vld [vmem:[%s2991_s24 + $0x68] sm:$0xff]  ;;  %v2463_v49 = vld [vmem:[%s2991_s24 + $0x60] sm:$0xff] }
 0x5cf   : > { %2625 = vpow2.f32 %v1256_v0  ;;  %v1481_v28 = vadd.f32 %v1480_v43, %v3167_v58  ;;  %v1482_v18 = vpop.f32.mrb[35].mxu1  ;;  %v1495_v15 = vmax.f32 %v1477_v42, 0.0 }
 0x5d0   : > { %2627 = vpow2.f32 %v1258_v20  ;;  %v1483_v47 = vadd.f32 %v1482_v18, %v3167_v58  ;;  %v1496_v46 = vmax.f32 %v1479_v7, 0.0  ;;  %v2465_v20 = vld [vmem:[%s2991_s24 + $0x70] sm:$0xff]  ;;  %s3697_s24 = sshll.u32 %s2809_s30, 11 }
 0x5d1   : > { %v1497_v14 = vmax.f32 %v1481_v28, 0.0  ;;  %s3545_s25 = scalar_lea.hbm %s3689_s7, %s3697_s24 }
 0x5d2   : > { %v1498_v10 = vmax.f32 %v1483_v47, 0.0 }
 0x5d3   : > { %v1507_v50 = vpack.c.bf16 %v1497_v14, %v1495_v15 }
 0x5d4   : > { %v1508_v48 = vpack.c.bf16 %v1498_v10, %v1496_v46  ;;  %v1486_v51 = vpop.f32.mrb[36].mxu1  ;;  %v1768_v46 = vpack.c.bf16 %v2465_v20, %v2463_v49 }
 0x5d5   : > { %v1488_v53 = vpop.f32.mrb[37].mxu1  ;;  %v1487_v52 = vadd.f32 %v1486_v51, %v3169_v59  ;;  %v2599_v51 = vld [vmem:[%s3685_s3 + $0x10] sm:$0xff]  }
 0x5d6   : > { %v1490_v9 = vpop.f32.mrb[38].mxu1  ;;  %1551 = vmatprep.subr.bf16.mxu0 %v1508_v48  ;;  %v1489_v31 = vadd.f32 %v1488_v53, %v3169_v59  ;;  %v1769_v59 = vpack.c.bf16 %v2466_v40, %v2464_v39  ;;  %v1235_v40 = vmax.f32 %v3347_v26, 0.0 }
 0x5d7   : > { %v2622_v54 = vpop.eup %2621  ;;  %v1491_v57 = vadd.f32 %v1490_v9, %v3171_v60  ;;  %v1492_v16 = vpop.f32.mrb[39].mxu1  ;;  %1552 = vmatpush1.bf16.msra.mxu0 %v1507_v50  ;;  %v1499_v56 = vmax.f32 %v1487_v52, 0.0  ;;  %v1233_v50 = vmax.f32 %v3339_v44, 0.0 }
 0x5d8   : > { %v2624_v41 = vpop.eup %2623  ;;  %v1260_v21 = vadd.f32 1.0, %v2622_v54  ;;  %v1263_v33 = vmul.f32 -0.5, %v2622_v54  ;;  %v1493_v35 = vadd.f32 %v1492_v16, %v3171_v60  ;;  %v1500_v0 = vmax.f32 %v1489_v31, 0.0 }
 0x5d9   : > { %v2626_v58 = vpop.eup %2625  ;;  %v1269_v27 = vadd.f32 1.0, %v2624_v41  ;;  %v1501_v23 = vmax.f32 %v1491_v57, 0.0  ;;  %v1272_v32 = vmul.f32 -0.5, %v2624_v41  ;;  %v1266_v28 = vand.u32 2147483647, %v2622_v54 }
 0x5da   : > { %v3357_v22 = vpop.eup %2627  ;;  %2629 = vlog2.f32 %v1260_v21  ;;  %v1278_v30 = vadd.f32 1.0, %v2626_v58  ;;  %v1281_v37 = vmul.f32 -0.5, %v2626_v58  ;;  %v1502_v42 = vmax.f32 %v1493_v35, 0.0 }
 0x5db   : > { %2631 = vlog2.f32 %v1269_v27  ;;  %v1287_v24 = vadd.f32 1.0, %v3357_v22  ;;  %v1509_v38 = vpack.c.bf16 %v1501_v23, %v1499_v56  ;;  %v1264_v7 = vadd.f32 1.0, %v1263_v33 }
 0x5dc   : > { %2633 = vlog2.f32 %v1278_v30  ;;  %v1290_v43 = vmul.f32 -0.5, %v3357_v22  ;;  %v1273_v18 = vadd.f32 1.0, %v1272_v32  ;;  %v1510_v47 = vpack.c.bf16 %v1502_v42, %v1500_v0 }
 0x5dd   : > { %2635 = vlog2.f32 %v1287_v24  ;;  %v1275_v15 = vand.u32 2147483647, %v2624_v41  ;;  %v1282_v14 = vadd.f32 1.0, %v1281_v37  ;;  %v1232_v60 = vmax.f32 %v3336_v8, 0.0 }
 0x5de   : > { %v1284_v48 = vand.u32 2147483647, %v2626_v58  ;;  %1553 = vmatprep.subr.bf16.mxu0 %v1510_v47  ;;  %v1265_v57 = vmul.f32 %v2622_v54, %v1264_v7  ;;  %v1291_v16 = vadd.f32 1.0, %v1290_v43  ;;  %vm1267_vm12 = vcmp.lt.f32.partialorder %v1266_v28, 0.0004427343 }
 0x5df   : > { %1554 = vmatpush1.bf16.msra.mxu0 %v1509_v38  ;;  %v1274_v27 = vmul.f32 %v2624_v41, %v1273_v18  ;;  %v1293_v30 = vand.u32 2147483647, %v3357_v22  ;;  %vm1276_vm13 = vcmp.lt.f32.partialorder %v1275_v15, 0.0004427343  ;;  %v1283_v56 = vmul.f32 %v2626_v58, %v1282_v14 }
 0x5e0   : > { %1770 = vmatprep.subr.bf16.mxu0 %v1769_v59  ;;  %v1234_v54 = vmax.f32 %v3343_v55, 0.0  ;;  %vm1285_vm14 = vcmp.lt.f32.partialorder %v1284_v48, 0.0004427343  ;;  %v1292_v41 = vmul.f32 %v3357_v22, %v1291_v16 }
 0x5e1   : > { %vm1294_vm15 = vcmp.lt.f32.partialorder %v1293_v30, 0.0004427343 }
 0x5e2   : > { %2451 = vmatmul.mubr.msk.bf16.vlgmr.msra.gmra.mrb[40].mxu0 %vm525_vm1, %v2599_v51 }
 0x5e3   : > { %1771 = vmatpush1.bf16.msra.mxu0 %v1768_v46  ;;  %1593 = vmatprep.mubr.bf16.mxu0 %v3709_v17 }
 0x5e4   : > { %v2630_v10 = vpop.eup %2629 }
 0x5e5   : > { %v2632_v53 = vpop.eup %2631  ;;  %v1262_v9 = vmul.f32 0.6931472, %v2630_v10 }
 0x5e6   : > { %v2634_v21 = vpop.eup %2633  ;;  %v1271_v52 = vmul.f32 0.6931472, %v2632_v53 }
 0x5e7   : > { %v1268_v23 = vsel %vm1267_vm12, %v1265_v57, %v1262_v9  ;;  %v1280_v24 = vmul.f32 0.6931472, %v2634_v21  ;;  %v2636_v31 = vpop.eup %2635 }
 0x5e8   : > { %v1296_v33 = vadd.f32 %v1268_v23, %v1232_v60  ;;  %v1277_v32 = vsel %vm1276_vm13, %v1274_v27, %v1271_v52  ;;  %v1289_v37 = vmul.f32 0.6931472, %v2636_v31  ;;  %v2669_v60 = vld [vmem:[%s3683_s1] sm:$0xff]  }
 0x5e9   : > { %v1297_v38 = vadd.f32 %v1277_v32, %v1233_v50  ;;  %v1286_v35 = vsel %vm1285_vm14, %v1283_v56, %v1280_v24 }
 0x5ea   : > { %v1300_v58 = vsel %vm1236_vm10, %v3336_v8, %v1296_v33  ;;  %v1298_v39 = vadd.f32 %v1286_v35, %v1234_v54  ;;  %v1295_v22 = vsel %vm1294_vm15, %v1292_v41, %v1289_v37  ;;  %v2600_v8 = vld [vmem:[%s3685_s3 + $0x18] sm:$0xff]  }
 0x5eb   : > { %v1304_v0 = vmul.f32 0.9, %v1300_v58  ;;  %v1301_v42 = vsel %vm1237_vm11, %v3339_v44, %v1297_v38  ;;  %v1299_v7 = vadd.f32 %v1295_v22, %v1235_v40  ;;  %2452 = vmatmul.mubr.msk.bf16.gmra.mrb[44].mxu0 %vm525_vm1, %v2600_v8 }
 0x5ec   : > { %v1305_v49 = vmul.f32 0.9, %v1301_v42  ;;  %v1302_v20 = vsel %vm1238_vm2, %v3343_v55, %v1298_v39  ;;  %1802 = vmatprep.mubr.bf16.mxu0 %v3709_v17 }
 0x5ed   : > { %v1308_v43 = vadd.f32 0.1, %v1304_v0  ;;  %v1306_v28 = vmul.f32 0.9, %v1302_v20  ;;  %v1303_v18 = vsel %vm1239_vm3, %v3347_v26, %v1299_v7  ;;  %v2670_v26 = vld [vmem:[%s3683_s1 + $0x8] sm:$0xff]  }
 0x5ee   : > { %v1309_v44 = vadd.f32 0.1, %v1305_v49  ;;  %v1307_v15 = vmul.f32 0.9, %v1303_v18 }
 0x5ef   : > { %v1317_v47 = vmul.f32 %v1308_v43, %v1308_v43  ;;  %v1310_v59 = vadd.f32 0.1, %v1306_v28 }
 0x5f0   : > { %v1318_v55 = vmul.f32 %v1309_v44, %v1309_v44  ;;  %v1311_v46 = vadd.f32 0.1, %v1307_v15 }
 0x5f1   : > { %2427 = vst [vmem:[%s3282_s15 + $0x20] sm:$0xff] %v1317_v47  ;;  %v1319_v14 = vmul.f32 %v1310_v59, %v1310_v59  ;;  %v3430_v47 = vld [vmem:[%s3687_s5] sm:$0xff]  }
 0x5f2   : > { %2428 = vst [vmem:[%s3282_s15 + $0x28] sm:$0xff] %v1318_v55  ;;  %v1320_v10 = vmul.f32 %v1311_v46, %v1311_v46 }
 0x5f3   : > { %2429 = vst [vmem:[%s3282_s15 + $0x30] sm:$0xff] %v1319_v14  ;;  %2467 = vmatmul.mubr.msk.bf16.vlgmr.msra.gmra.mrb[48].mxu0 %vm415_vm0, %v2669_v60 }
 0x5f4   : > { %2430 = vst [vmem:[%s3282_s15 + $0x38] sm:$0xff] %v1320_v10  ;;  %1812 = vmatprep.mubr.bf16.mxu0 %v3709_v17 }
 0x5fb   : > { %2468 = vmatmul.mubr.msk.bf16.gmra.mrb[52].mxu0 %vm415_vm0, %v2670_v26 }
 0x5fc   : > { %2020 = vmatprep.mubr.bf16.mxu0 %v3709_v17 }
 0x6b5   : > { %v1585_v50 = vpop.f32.mrb[40].mxu0 }
 0x6b6   : > { %v1586_v48 = vadd.f32 %v1585_v50, %v3173_v61  ;;  %v1587_v51 = vpop.f32.mrb[41].mxu0 }
 0x6b7   : > { %v1588_v53 = vadd.f32 %v1587_v51, %v3173_v61  ;;  %v1589_v9 = vpop.f32.mrb[42].mxu0 }
 0x6b8   : > { %v1590_v57 = vadd.f32 %v1589_v9, %v3175_v62  ;;  %v1591_v16 = vpop.f32.mrb[43].mxu0  ;;  %v1604_v52 = vmax.f32 %v1586_v48, 0.0 }
 0x6b9   : > { %v1592_v21 = vadd.f32 %v1591_v16, %v3175_v62  ;;  %v1605_v30 = vmax.f32 %v1588_v53, 0.0 }
 0x6ba   : > { %v1606_v27 = vmax.f32 %v1590_v57, 0.0  ;;  %v2601_v57 = vld [vmem:[%s3685_s3] sm:$0xff]  }
 0x6bb   : > { %v1607_v23 = vmax.f32 %v1592_v21, 0.0 }
 0x6bc   : > { %v1612_v24 = vpack.c.bf16 %v1606_v27, %v1604_v52 }
 0x6bd   : > { %v1613_v56 = vpack.c.bf16 %v1607_v23, %v1605_v30 }
 0x6be   : > { %v1595_v31 = vpop.f32.mrb[44].mxu0 }
 0x6bf   : > { %v1596_v33 = vadd.f32 %v1595_v31, %v3177_v63  ;;  %v1597_v32 = vpop.f32.mrb[45].mxu0  ;;  %1616 = vmatprep.subr.bf16.mxu1 %v1613_v56 }
 0x6c0   : > { %v1598_v54 = vadd.f32 %v1597_v32, %v3177_v63  ;;  %v1599_v38 = vpop.f32.mrb[46].mxu0  ;;  %1617 = vmatpush1.bf16.msra.mxu1 %v1612_v24 }
 0x6c1   : > { %v1600_v61 = vadd.f32 %v1599_v38, %v3179_v1  ;;  %v1601_v35 = vpop.f32.mrb[47].mxu0  ;;  %v1608_v37 = vmax.f32 %v1596_v33, 0.0 }
 0x6c2   : > { %v1602_v62 = vadd.f32 %v1601_v35, %v3179_v1  ;;  %v1609_v58 = vmax.f32 %v1598_v54, 0.0 }
 0x6c3   : > { %v1610_v41 = vmax.f32 %v1600_v61, 0.0 }
 0x6c4   : > { %v1611_v39 = vmax.f32 %v1602_v62, 0.0 }
 0x6c5   : > { %v1614_v40 = vpack.c.bf16 %v1610_v41, %v1608_v37 }
 0x6c6   : > { %v1615_v0 = vpack.c.bf16 %v1611_v39, %v1609_v58  ;;  %v1804_v42 = vpop.f32.mrb[48].mxu0 }
 0x6c7   : > { %v1805_v22 = vadd.f32 %v1804_v42, %v3069_v25  ;;  %v1806_v49 = vpop.f32.mrb[49].mxu0 }
 0x6c8   : > { %v1807_v63 = vadd.f32 %v1806_v49, %v3069_v25  ;;  %1618 = vmatprep.subr.bf16.mxu1 %v1615_v0  ;;  %v1808_v20 = vpop.f32.mrb[50].mxu0 }
 0x6c9   : > { %v1809_v7 = vadd.f32 %v1808_v20, %v3072_v29  ;;  %1619 = vmatpush1.bf16.msra.mxu1 %v1614_v40  ;;  %v1810_v8 = vpop.f32.mrb[51].mxu0  ;;  %v1823_v43 = vmax.f32 %v1805_v22, 0.0 }
 0x6ca   : > { %v1811_v1 = vadd.f32 %v1810_v8, %v3072_v29  ;;  %v1824_v44 = vmax.f32 %v1807_v63, 0.0 }
 0x6cb   : > { %v1825_v28 = vmax.f32 %v1809_v7, 0.0 }
 0x6cc   : > { %v1826_v18 = vmax.f32 %v1811_v1, 0.0  ;;  %2453 = vmatmul.mubr.msk.bf16.vlgmr.msra.gmra.mrb[40].mxu1 %vm525_vm1, %v3430_v47 }
 0x6cd   : > { %v1835_v25 = vpack.c.bf16 %v1825_v28, %v1823_v43  ;;  %1658 = vmatprep.mubr.bf16.mxu1 %v3709_v17 }
 0x6ce   : > { %v1836_v59 = vpack.c.bf16 %v1826_v18, %v1824_v44  ;;  %v1814_v15 = vpop.f32.mrb[52].mxu0 }
 0x6cf   : > { %v1815_v55 = vadd.f32 %v1814_v15, %v3076_v34  ;;  %v1816_v29 = vpop.f32.mrb[53].mxu0 }
 0x6d0   : > { %v1817_v14 = vadd.f32 %v1816_v29, %v3076_v34  ;;  %v1818_v46 = vpop.f32.mrb[54].mxu0  ;;  %1879 = vmatprep.subr.bf16.mxu1 %v1836_v59 }
 0x6d1   : > { %v1819_v10 = vadd.f32 %v1818_v46, %v3080_v45  ;;  %v1820_v60 = vpop.f32.mrb[55].mxu0  ;;  %1880 = vmatpush1.bf16.msra.mxu1 %v1835_v25  ;;  %v1827_v50 = vmax.f32 %v1815_v55, 0.0 }
 0x6d2   : > { %v1821_v26 = vadd.f32 %v1820_v60, %v3080_v45  ;;  %v1828_v51 = vmax.f32 %v1817_v14, 0.0  ;;  %v2602_v45 = vld [vmem:[%s3685_s3 + $0x8] sm:$0xff]  }
 0x6d3   : > { %v1829_v48 = vmax.f32 %v1819_v10, 0.0 }
 0x6d4   : > { %v1830_v53 = vmax.f32 %v1821_v26, 0.0  ;;  %2454 = vmatmul.mubr.msk.bf16.gmra.mrb[44].mxu1 %vm525_vm1, %v3132_v36 }
 0x6d5   : > { %v1837_v9 = vpack.c.bf16 %v1829_v48, %v1827_v50  ;;  %1911 = vmatprep.mubr.bf16.mxu1 %v3709_v17 }
 0x6d6   : > { %v1838_v34 = vpack.c.bf16 %v1830_v53, %v1828_v51 }
 0x6d8   : > { %1881 = vmatprep.subr.bf16.mxu1 %v1838_v34 }
 0x6d9   : > { %1882 = vmatpush1.bf16.msra.mxu1 %v1837_v9 }
 0x6dc   : > { %2471 = vmatmul.mubr.msk.bf16.vlgmr.msra.gmra.mrb[48].mxu1 %vm525_vm1, %v2601_v57 }
 0x6dd   : > { %1921 = vmatprep.mubr.bf16.mxu1 %v3709_v17 }
 0x6e4   : > { %2472 = vmatmul.mubr.msk.bf16.gmra.mrb[52].mxu1 %vm525_vm1, %v2602_v45 }
 0x6e5   : > { %2085 = vmatprep.mubr.bf16.mxu1 %v3709_v17 }
 0x79f   : > { %v1650_v36 = vpop.f32.mrb[40].mxu1 }
 0x7a0   : > { %v1651_v16 = vadd.f32 %v1650_v36, %v3201_v13  ;;  %v1652_v21 = vpop.f32.mrb[41].mxu1 }
 0x7a1   : > { %v1653_v52 = vadd.f32 %v1652_v21, %v3201_v13  ;;  %v1654_v27 = vpop.f32.mrb[42].mxu1 }
 0x7a2   : > { %2455 = vst [vmem:[%s3208_s14 + $0x40] sm:$0xff] %v1651_v16  ;;  %v1655_v30 = vadd.f32 %v1654_v27, %v3204_v19  ;;  %v1656_v23 = vpop.f32.mrb[43].mxu1 }
 0x7a3   : > { %2456 = vst [vmem:[%s3208_s14 + $0x48] sm:$0xff] %v1653_v52  ;;  %v1657_v24 = vadd.f32 %v1656_v23, %v3204_v19 }
 0x7a4   : > { %2457 = vst [vmem:[%s3208_s14 + $0x50] sm:$0xff] %v1655_v30 }
 0x7a5   : > { %2458 = vst [vmem:[%s3208_s14 + $0x58] sm:$0xff] %v1657_v24 }
 0x7a7   : > { %v1660_v56 = vpop.f32.mrb[44].mxu1 }
 0x7a8   : > { %v3461_v31 = vadd.f32 %v1660_v56, %v3197_v11  ;;  %v1662_v33 = vpop.f32.mrb[45].mxu1 }
 0x7a9   : > { %v3464_v32 = vadd.f32 %v1662_v33, %v3197_v11  ;;  %v1664_v54 = vpop.f32.mrb[46].mxu1 }
 0x7aa   : > { %v1681_v38 = vand.u32 2147483647, %v3461_v31  ;;  %v3468_v61 = vadd.f32 %v1664_v54, %v3199_v12  ;;  %v1666_v35 = vpop.f32.mrb[47].mxu1  ;;  %vm1673_vm0 = vcmp.ne.f32.partialorder %v3461_v31, %v3461_v31 }
 0x7ab   : > { %v1682_v62 = vand.u32 2147483647, %v3464_v32  ;;  %v3472_v37 = vadd.f32 %v1666_v35, %v3199_v12  ;;  %vm1674_vm4 = vcmp.ne.f32.partialorder %v3464_v32, %v3464_v32 }
 0x7ac   : > { %v1685_v41 = vsub.f32 0.0, %v1681_v38  ;;  %v1683_v58 = vand.u32 2147483647, %v3468_v61  ;;  %vm1675_vm9 = vcmp.ne.f32.partialorder %v3468_v61, %v3468_v61 }
 0x7ad   : > { %v1686_v39 = vsub.f32 0.0, %v1682_v62  ;;  %v1684_v40 = vand.u32 2147483647, %v3472_v37  ;;  %vm1676_vm10 = vcmp.ne.f32.partialorder %v3472_v37, %v3472_v37 }
 0x7ae   : > { %v1689_v0 = vmul.f32 1.442695, %v1685_v41  ;;  %v1687_v42 = vsub.f32 0.0, %v1683_v58 }
 0x7af   : > { %v1691_v22 = vmul.f32 1.442695, %v1686_v39  ;;  %v1688_v49 = vsub.f32 0.0, %v1684_v40  ;;  %v1913_v63 = vpop.f32.mrb[48].mxu1 }
 0x7b0   : > { %2637 = vpow2.f32 %v1689_v0  ;;  %v1693_v20 = vmul.f32 1.442695, %v1687_v42  ;;  %v1914_v7 = vadd.f32 %v1913_v63, %v3181_v2  ;;  %v1915_v8 = vpop.f32.mrb[49].mxu1  ;;  %v1669_v42 = vmax.f32 %v3461_v31, 0.0 }
 0x7b1   : > { %2639 = vpow2.f32 %v1691_v22  ;;  %v1695_v1 = vmul.f32 1.442695, %v1688_v49  ;;  %v1916_v43 = vadd.f32 %v1915_v8, %v3181_v2  ;;  %v1917_v28 = vpop.f32.mrb[50].mxu1 }
 0x7b2   : > { %2641 = vpow2.f32 %v1693_v20  ;;  %v1918_v44 = vadd.f32 %v1917_v28, %v3183_v3  ;;  %v1919_v18 = vpop.f32.mrb[51].mxu1  ;;  %v1932_v59 = vmax.f32 %v1914_v7, 0.0 }
 0x7b3   : > { %2643 = vpow2.f32 %v1695_v1  ;;  %v1920_v25 = vadd.f32 %v1919_v18, %v3183_v3  ;;  %v1933_v55 = vmax.f32 %v1916_v43, 0.0 }
 0x7b4   : > { %v1934_v15 = vmax.f32 %v1918_v44, 0.0 }
 0x7b5   : > { %v1935_v29 = vmax.f32 %v1920_v25, 0.0 }
 0x7b6   : > { %v1944_v14 = vpack.c.bf16 %v1934_v15, %v1932_v59 }
 0x7b7   : > { %v1945_v46 = vpack.c.bf16 %v1935_v29, %v1933_v55  ;;  %v1923_v10 = vpop.f32.mrb[52].mxu1  ;;  %v1671_v29 = vmax.f32 %v3468_v61, 0.0 }
 0x7b8   : > { %v1925_v60 = vpop.f32.mrb[53].mxu1  ;;  %v1924_v9 = vadd.f32 %v1923_v10, %v3185_v4 }
 0x7b9   : > { %v1927_v26 = vpop.f32.mrb[54].mxu1  ;;  %1988 = vmatprep.subr.bf16.mxu0 %v1945_v46  ;;  %v1926_v52 = vadd.f32 %v1925_v60, %v3185_v4  ;;  %v1670_v4 = vmax.f32 %v3464_v32, 0.0 }
 0x7ba   : > { %v2638_v50 = vpop.eup %2637  ;;  %v1928_v2 = vadd.f32 %v1927_v26, %v3187_v5  ;;  %v1929_v48 = vpop.f32.mrb[55].mxu1  ;;  %1989 = vmatpush1.bf16.msra.mxu0 %v1944_v14  ;;  %v1936_v21 = vmax.f32 %v1924_v9, 0.0 }
 0x7bb   : > { %v2640_v51 = vpop.eup %2639  ;;  %v1697_v53 = vadd.f32 1.0, %v2638_v50  ;;  %v1700_v27 = vmul.f32 -0.5, %v2638_v50  ;;  %v1930_v24 = vadd.f32 %v1929_v48, %v3187_v5  ;;  %v1937_v33 = vmax.f32 %v1926_v52, 0.0  ;;  %v2603_v5 = vld [vmem:[%s3685_s3 + $0x10] sm:$0xff]  }
 0x7bc   : > { %v2642_v3 = vpop.eup %2641  ;;  %v1706_v34 = vadd.f32 1.0, %v2640_v51  ;;  %v1938_v36 = vmax.f32 %v1928_v2, 0.0  ;;  %v1709_v30 = vmul.f32 -0.5, %v2640_v51  ;;  %v1703_v62 = vand.u32 2147483647, %v2638_v50 }
 0x7bd   : > { %v2644_v57 = vpop.eup %2643  ;;  %2645 = vlog2.f32 %v1697_v53  ;;  %v1715_v45 = vadd.f32 1.0, %v2642_v3  ;;  %v1718_v56 = vmul.f32 -0.5, %v2642_v3  ;;  %v1939_v54 = vmax.f32 %v1930_v24, 0.0 }
 0x7be   : > { %2647 = vlog2.f32 %v1706_v34  ;;  %v1724_v16 = vadd.f32 1.0, %v2644_v57  ;;  %v1946_v23 = vpack.c.bf16 %v1938_v36, %v1936_v21  ;;  %v1701_v38 = vadd.f32 1.0, %v1700_v27  ;;  %v2604_v34 = vld [vmem:[%s3685_s3 + $0x18] sm:$0xff]  }
 0x7bf   : > { %2649 = vlog2.f32 %v1715_v45  ;;  %v1727_v35 = vmul.f32 -0.5, %v2644_v57  ;;  %v1710_v41 = vadd.f32 1.0, %v1709_v30  ;;  %v1947_v58 = vpack.c.bf16 %v1939_v54, %v1937_v33 }
 0x7c0   : > { %2651 = vlog2.f32 %v1724_v16  ;;  %v1712_v39 = vand.u32 2147483647, %v2640_v51  ;;  %v1719_v40 = vadd.f32 1.0, %v1718_v56  ;;  %v1721_v22 = vand.u32 2147483647, %v2642_v3 }
 0x7c1   : > { %1990 = vmatprep.subr.bf16.mxu0 %v1947_v58  ;;  %v1702_v20 = vmul.f32 %v2638_v50, %v1701_v38  ;;  %v1728_v7 = vadd.f32 1.0, %v1727_v35  ;;  %vm1704_vm5 = vcmp.lt.f32.partialorder %v1703_v62, 0.0004427343  ;;  %v1711_v43 = vmul.f32 %v2640_v51, %v1710_v41  ;;  %v3710_v38 = vld [vmem:[#allocation11_spill] sm:$0xff] }
 0x7c2   : > { %1991 = vmatpush1.bf16.msra.mxu0 %v1946_v23  ;;  %v1730_v28 = vand.u32 2147483647, %v2644_v57  ;;  %vm1713_vm6 = vcmp.lt.f32.partialorder %v1712_v39, 0.0004427343  ;;  %v1720_v25 = vmul.f32 %v2642_v3, %v1719_v40  ;;  %vm1722_vm7 = vcmp.lt.f32.partialorder %v1721_v22, 0.0004427343 }
 0x7c3   : > { %v1729_v60 = vmul.f32 %v2644_v57, %v1728_v7  ;;  %v1672_v2 = vmax.f32 %v3472_v37, 0.0 }
 0x7c4   : > { %vm1731_vm8 = vcmp.lt.f32.partialorder %v1730_v28, 0.0004427343 }
 0x7c5   : > { %2483 = vmatmul.mubr.msk.bf16.vlgmr.msra.gmra.mrb[56].mxu0 %vm525_vm1, %v2603_v5  ;;  %v3711_v5 = vld [vmem:[#allocation12_spill] sm:$0xff] }
 0x7c6   : > { %2030 = vmatprep.mubr.bf16.mxu0 %v3709_v17 }
 0x7c7   : > { %v2646_v0 = vpop.eup %2645 }
 0x7c8   : > { %v2648_v49 = vpop.eup %2647  ;;  %v1699_v63 = vmul.f32 0.6931472, %v2646_v0 }
 0x7c9   : > { %v2650_v8 = vpop.eup %2649  ;;  %v1708_v1 = vmul.f32 0.6931472, %v2648_v49 }
 0x7ca   : > { %v1705_v44 = vsel %vm1704_vm5, %v1702_v20, %v1699_v63  ;;  %v1717_v18 = vmul.f32 0.6931472, %v2650_v8  ;;  %v2652_v59 = vpop.eup %2651 }
 0x7cb   : > { %v1733_v15 = vadd.f32 %v1705_v44, %v1669_v42  ;;  %v1714_v55 = vsel %vm1713_vm6, %v1711_v43, %v1708_v1  ;;  %v1726_v10 = vmul.f32 0.6931472, %v2652_v59 }
 0x7cc   : > { %v1734_v14 = vadd.f32 %v1714_v55, %v1670_v4  ;;  %v1723_v46 = vsel %vm1722_vm7, %v1720_v25, %v1717_v18  ;;  %v2672_v55 = vld [vmem:[%s3687_s5 + $0x8] sm:$0xff]  }
 0x7cd   : > { %v1737_v26 = vsel %vm1673_vm0, %v3461_v31, %v1733_v15  ;;  %v1735_v50 = vadd.f32 %v1723_v46, %v1671_v29  ;;  %v1732_v53 = vsel %vm1731_vm8, %v1729_v60, %v1726_v10  ;;  %2484 = vmatmul.mubr.msk.bf16.gmra.mrb[60].mxu0 %vm525_vm1, %v2604_v34 }
 0x7ce   : > { %v1741_v48 = vmul.f32 0.9, %v1737_v26  ;;  %v1738_v51 = vsel %vm1674_vm4, %v3464_v32, %v1734_v14  ;;  %v1736_v31 = vadd.f32 %v1732_v53, %v1672_v2 }
 0x7cf   : > { %v1742_v9 = vmul.f32 0.9, %v1738_v51  ;;  %v1739_v3 = vsel %vm1675_vm9, %v3468_v61, %v1735_v50 }
 0x7d0   : > { %v1745_v57 = vadd.f32 0.1, %v1741_v48  ;;  %v1743_v45 = vmul.f32 0.9, %v1739_v3  ;;  %v1740_v36 = vsel %vm1676_vm10, %v3472_v37, %v1736_v31 }
 0x7d1   : > { %v1746_v32 = vadd.f32 0.1, %v1742_v9  ;;  %v1744_v52 = vmul.f32 0.9, %v1740_v36 }
 0x7d2   : > { %v1754_v16 = vmul.f32 %v1745_v57, %v1745_v57  ;;  %v1747_v21 = vadd.f32 0.1, %v1743_v45 }
 0x7d3   : > { %v1755_v61 = vmul.f32 %v1746_v32, %v1746_v32  ;;  %v1748_v30 = vadd.f32 0.1, %v1744_v52 }
 0x7d4   : > { %2459 = vst [vmem:[%s3282_s15 + $0x40] sm:$0xff] %v1754_v16  ;;  %v1756_v27 = vmul.f32 %v1747_v21, %v1747_v21 }
 0x7d5   : > { %2460 = vst [vmem:[%s3282_s15 + $0x48] sm:$0xff] %v1755_v61  ;;  %v1757_v23 = vmul.f32 %v1748_v30, %v1748_v30 }
 0x7d6   : > { %2461 = vst [vmem:[%s3282_s15 + $0x50] sm:$0xff] %v1756_v27 }
 0x7d7   : > { %2462 = vst [vmem:[%s3282_s15 + $0x58] sm:$0xff] %v1757_v23 }
 0x898   : > { %v2022_v24 = vpop.f32.mrb[56].mxu0 }
 0x899   : > { %v2023_v56 = vadd.f32 %v2022_v24, %v3189_v6  ;;  %v2024_v33 = vpop.f32.mrb[57].mxu0 }
 0x89a   : > { %v2025_v54 = vadd.f32 %v2024_v33, %v3189_v6  ;;  %v2026_v37 = vpop.f32.mrb[58].mxu0  ;;  %v3712_v6 = vld [vmem:[#allocation13_spill] sm:$0xff] }
 0x89b   : > { %v2027_v35 = vadd.f32 %v2026_v37, %v3710_v38  ;;  %v2028_v62 = vpop.f32.mrb[59].mxu0  ;;  %v2041_v58 = vmax.f32 %v2023_v56, 0.0 }
 0x89c   : > { %v2029_v41 = vadd.f32 %v2028_v62, %v3710_v38  ;;  %v2042_v40 = vmax.f32 %v2025_v54, 0.0 }
 0x89d   : > { %v2043_v39 = vmax.f32 %v2027_v35, 0.0 }
 0x89e   : > { %v2044_v0 = vmax.f32 %v2029_v41, 0.0 }
 0x89f   : > { %v2049_v42 = vpack.c.bf16 %v2043_v39, %v2041_v58 }
 0x8a0   : > { %v2050_v4 = vpack.c.bf16 %v2044_v0, %v2042_v40  ;;  %v2032_v22 = vpop.f32.mrb[60].mxu0 }
 0x8a1   : > { %v2033_v49 = vadd.f32 %v2032_v22, %v3711_v5  ;;  %v2034_v63 = vpop.f32.mrb[61].mxu0 }
 0x8a2   : > { %v2035_v20 = vadd.f32 %v2034_v63, %v3711_v5  ;;  %v2036_v7 = vpop.f32.mrb[62].mxu0  ;;  %2053 = vmatprep.subr.bf16.mxu1 %v2050_v4 }
 0x8a3   : > { %v2037_v8 = vadd.f32 %v2036_v7, %v3712_v6  ;;  %v2038_v1 = vpop.f32.mrb[63].mxu0  ;;  %2054 = vmatpush1.bf16.msra.mxu1 %v2049_v42  ;;  %v2045_v28 = vmax.f32 %v2033_v49, 0.0 }
 0x8a4   : > { %v2039_v43 = vadd.f32 %v2038_v1, %v3712_v6  ;;  %v2046_v18 = vmax.f32 %v2035_v20, 0.0 }
 0x8a5   : > { %v2047_v44 = vmax.f32 %v2037_v8, 0.0 }
 0x8a6   : > { %v2048_v25 = vmax.f32 %v2039_v43, 0.0 }
 0x8a7   : > { %v2051_v59 = vpack.c.bf16 %v2047_v44, %v2045_v28 }
 0x8a8   : > { %v2052_v15 = vpack.c.bf16 %v2048_v25, %v2046_v18 }
 0x8aa   : > { %2055 = vmatprep.subr.bf16.mxu1 %v2052_v15 }
 0x8ab   : > { %2056 = vmatpush1.bf16.msra.mxu1 %v2051_v59 }
 0x8ae   : > { %2485 = vmatmul.mubr.msk.bf16.vlgmr.msra.gmra.mrb[56].mxu1 %vm525_vm1, %v3430_v47 }
 0x8af   : > { %2095 = vmatprep.mubr.bf16.mxu1 %v3709_v17 }
 0x8b6   : > { %2486 = vmatmul.mubr.msk.bf16.gmra.mrb[60].mxu1 %vm525_vm1, %v2672_v55 }
 0x981   : > { %v2087_v29 = vpop.f32.mrb[56].mxu1 }
 0x982   : > { %v2088_v14 = vadd.f32 %v2087_v29, %v3201_v13  ;;  %v2089_v46 = vpop.f32.mrb[57].mxu1 }
 0x983   : > { %v2090_v47 = vadd.f32 %v2089_v46, %v3201_v13  ;;  %v2091_v10 = vpop.f32.mrb[58].mxu1 }
 0x984   : > { %2487 = vst [vmem:[%s3208_s14 + $0x60] sm:$0xff] %v2088_v14  ;;  %v2092_v17 = vadd.f32 %v2091_v10, %v3204_v19  ;;  %v2093_v60 = vpop.f32.mrb[59].mxu1 }
 0x985   : > { %2488 = vst [vmem:[%s3208_s14 + $0x68] sm:$0xff] %v2090_v47  ;;  %v2094_v26 = vadd.f32 %v2093_v60, %v3204_v19 }
 0x986   : > { %2489 = vst [vmem:[%s3208_s14 + $0x70] sm:$0xff] %v2092_v17 }
 0x987   : > { %2490 = vst [vmem:[%s3208_s14 + $0x78] sm:$0xff] %v2094_v26 }
 0x988   : > { %2716 = shalt.err (!%p2713_p5)
}
 0x989   : > { %s2717_s14 = scalar_lea.hbm %s3545_s25, 2048  ;;  %s2721_s22 = scalar_lea.hbm %s3689_s7, 4096 }
 0x98a   : > { %p2718_p4 = scmp.ne.s32.totalorder %s3545_s25, %s2717_s14  ;;  %p2722_p12 = scmp.lt.u32.totalorder %s3545_s25, %s3689_s7 }
 0x98b   : > { %p2723_p1 = scmp.lt.u32.totalorder %s2721_s22, %s2717_s14  ;;  %p2725_p8 = scmp.lt.u32.totalorder %s2717_s14, %s3545_s25 }
 0x98c   : > { %p2719_p7 = pnand %p2718_p4, %p3713_p9 }
 0x98d   : > { %p2724_p3 = por %p2723_p1, %p2722_p12 }
 0x98e   : > { %p2720_p10 = pneg %p2719_p7 }
 0x98f   : > { %p2726_p11 = por %p2725_p8, %p2724_p3 }
 0x991   : > { %p2727_p0 = pnand %p2726_p11, %p2720_p10 }
 0x993   : > { %2730 = shalt.err (!%p2727_p0)
}
 0x994   : > { %s2824_s21 = smov 256   ;;  %s2825_s26 = smov 16   ;;  %v2097_v13 = vpop.f32.mrb[60].mxu1 }
 0x995   : > { %2513 = dma.vmem_to_hbm [thread:$0]  (%p3713_p9), %s3547_s12, 2048, %s3545_s25, %s2201_s23, %s2824_s21, %s2824_s21, %s2825_s26   ;;  %v3581_v19 = vadd.f32 %v2097_v13, %v3197_v11  ;;  %v2099_v50 = vpop.f32.mrb[61].mxu1 }
 0x996   : > { %v3584_v2 = vadd.f32 %v2099_v50, %v3197_v11  ;;  %v2101_v48 = vpop.f32.mrb[62].mxu1  ;;  %s2241_s24 = sshll.u32 %s3282_s15, 4  ;;  %s3714_s12 = sshll.u32 %s2809_s30, 11  ;;  %s3629_s24 = int_to_ptr.vmem [resolvable:$true] %s2241_s24 }
 0x997   : > { %v2118_v51 = vand.u32 2147483647, %v3581_v19  ;;  %v3588_v53 = vadd.f32 %v2101_v48, %v3199_v12  ;;  %v2103_v9 = vpop.f32.mrb[63].mxu1  ;;  %v2106_v4 = vmax.f32 %v3581_v19, 0.0  ;;  %vm2110_vm1 = vcmp.ne.f32.partialorder %v3581_v19, %v3581_v19  ;;  %s3627_s14 = scalar_lea.hbm %s3690_s8, %s3714_s12  ;;  %s2206_s16 = scalar_lea.sflag [#allocation7], %s2984_s11 }
 0x998   : > { %v2119_v3 = vand.u32 2147483647, %v3584_v2  ;;  %v3592_v31 = vadd.f32 %v2103_v9, %v3199_v12  ;;  %v2107_v22 = vmax.f32 %v3584_v2, 0.0  ;;  %vm2111_vm11 = vcmp.ne.f32.partialorder %v3584_v2, %v3584_v2  ;;  %s2731_s0 = scalar_lea.vmem %s3629_s24, 2048  ;;  %s2826_s22 = smov [#allocation6]  }
 0x999   : > { %v2122_v34 = vsub.f32 0.0, %v2118_v51  ;;  %v2120_v57 = vand.u32 2147483647, %v3588_v53  ;;  %v2108_v55 = vmax.f32 %v3588_v53, 0.0  ;;  %vm2112_vm2 = vcmp.ne.f32.partialorder %v3588_v53, %v3588_v53  ;;  %p2732_p6 = scmp.ne.s32.totalorder %s3629_s24, %s2731_s0  ;;  %s2735_s17 = sshll.u32 %s2826_s22, 4  ;;  %s2736_s17 = int_to_ptr.vmem [resolvable:$false] %s2735_s17 }
 0x99a   : > { %v2123_v45 = vsub.f32 0.0, %v2119_v3  ;;  %v2121_v32 = vand.u32 2147483647, %v3592_v31  ;;  %v2109_v60 = vmax.f32 %v3592_v31, 0.0  ;;  %vm2113_vm3 = vcmp.ne.f32.partialorder %v3592_v31, %v3592_v31  ;;  %s2737_s30 = scalar_lea.vmem %s2736_s17, 4096  ;;  %p2738_p5 = scmp.lt.s32.totalorder %s3629_s24, %s2736_s17 }
 0x99b   : > { %v2126_v11 = vmul.f32 1.442695, %v2122_v34  ;;  %v2124_v36 = vsub.f32 0.0, %v2120_v57  ;;  %p2733_p13 = pnand %p2732_p6, %p3713_p9  ;;  %p2739_p4 = scmp.lt.s32.totalorder %s2737_s30, %s2731_s0 }
 0x99c   : > { %v2128_v16 = vmul.f32 1.442695, %v2123_v45  ;;  %v2125_v21 = vsub.f32 0.0, %v2121_v32 }
 0x99d   : > { %2653 = vpow2.f32 %v2126_v11  ;;  %v2130_v52 = vmul.f32 1.442695, %v2124_v36  ;;  %p2734_p2 = pneg %p2733_p13  ;;  %p2740_p7 = por %p2739_p4, %p2738_p5 }
 0x99e   : > { %2655 = vpow2.f32 %v2128_v16  ;;  %v2132_v61 = vmul.f32 1.442695, %v2125_v21 }
 0x99f   : > { %2657 = vpow2.f32 %v2130_v52  ;;  %p2741_p10 = pnand %p2740_p7, %p2734_p2 }
 0x9a0   : > { %2659 = vpow2.f32 %v2132_v61 }
 0x9a7   : > { %v2654_v27 = vpop.eup %2653 }
 0x9a8   : > { %v2656_v30 = vpop.eup %2655  ;;  %v2134_v12 = vadd.f32 1.0, %v2654_v27  ;;  %v2137_v37 = vmul.f32 -0.5, %v2654_v27  ;;  %v2140_v58 = vand.u32 2147483647, %v2654_v27 }
 0x9a9   : > { %v2658_v23 = vpop.eup %2657  ;;  %v2143_v24 = vadd.f32 1.0, %v2656_v30  ;;  %v2146_v38 = vmul.f32 -0.5, %v2656_v30  ;;  %v2149_v40 = vand.u32 2147483647, %v2656_v30 }
 0x9aa   : > { %v2660_v56 = vpop.eup %2659  ;;  %2661 = vlog2.f32 %v2134_v12  ;;  %v2152_v33 = vadd.f32 1.0, %v2658_v23  ;;  %v2155_v35 = vmul.f32 -0.5, %v2658_v23  ;;  %v2138_v62 = vadd.f32 1.0, %v2137_v37 }
 0x9ab   : > { %2663 = vlog2.f32 %v2143_v24  ;;  %v2161_v54 = vadd.f32 1.0, %v2660_v56  ;;  %v2164_v41 = vmul.f32 -0.5, %v2660_v56  ;;  %v2147_v39 = vadd.f32 1.0, %v2146_v38 }
 0x9ac   : > { %2665 = vlog2.f32 %v2152_v33  ;;  %v2156_v0 = vadd.f32 1.0, %v2155_v35  ;;  %v2158_v5 = vand.u32 2147483647, %v2658_v23  ;;  %v2139_v20 = vmul.f32 %v2654_v27, %v2138_v62 }
 0x9ad   : > { %2667 = vlog2.f32 %v2161_v54  ;;  %v2165_v7 = vadd.f32 1.0, %v2164_v41  ;;  %vm2141_vm12 = vcmp.lt.f32.partialorder %v2140_v58, 0.0004427343  ;;  %v2148_v1 = vmul.f32 %v2656_v30, %v2147_v39 }
 0x9ae   : > { %v2167_v43 = vand.u32 2147483647, %v2660_v56  ;;  %vm2150_vm13 = vcmp.lt.f32.partialorder %v2149_v40, 0.0004427343  ;;  %v2157_v18 = vmul.f32 %v2658_v23, %v2156_v0  ;;  %vm2159_vm14 = vcmp.lt.f32.partialorder %v2158_v5, 0.0004427343 }
 0x9af   : > { %v2166_v47 = vmul.f32 %v2660_v56, %v2165_v7 }
 0x9b0   : > { %vm2168_vm15 = vcmp.lt.f32.partialorder %v2167_v43, 0.0004427343 }
 0x9b4   : > { %v2662_v42 = vpop.eup %2661 }
 0x9b5   : > { %v2664_v49 = vpop.eup %2663  ;;  %v2136_v63 = vmul.f32 0.6931472, %v2662_v42 }
 0x9b6   : > { %v2666_v6 = vpop.eup %2665  ;;  %v2145_v8 = vmul.f32 0.6931472, %v2664_v49 }
 0x9b7   : > { %v2142_v28 = vsel %vm2141_vm12, %v2139_v20, %v2136_v63  ;;  %v2154_v44 = vmul.f32 0.6931472, %v2666_v6  ;;  %v2668_v25 = vpop.eup %2667 }
 0x9b8   : > { %v2170_v59 = vadd.f32 %v2142_v28, %v2106_v4  ;;  %v2151_v15 = vsel %vm2150_vm13, %v2148_v1, %v2145_v8  ;;  %v2163_v46 = vmul.f32 0.6931472, %v2668_v25 }
 0x9b9   : > { %v2171_v29 = vadd.f32 %v2151_v15, %v2107_v22  ;;  %v2160_v14 = vsel %vm2159_vm14, %v2157_v18, %v2154_v44 }
 0x9ba   : > { %v2174_v10 = vsel %vm2110_vm1, %v3581_v19, %v2170_v59  ;;  %v2172_v17 = vadd.f32 %v2160_v14, %v2108_v55  ;;  %v2169_v50 = vsel %vm2168_vm15, %v2166_v47, %v2163_v46 }
 0x9bb   : > { %v2178_v26 = vmul.f32 0.9, %v2174_v10  ;;  %v2175_v13 = vsel %vm2111_vm11, %v3584_v2, %v2171_v29  ;;  %v2173_v51 = vadd.f32 %v2169_v50, %v2109_v60 }
 0x9bc   : > { %v2179_v48 = vmul.f32 0.9, %v2175_v13  ;;  %v2176_v19 = vsel %vm2112_vm2, %v3588_v53, %v2172_v17 }
 0x9bd   : > { %v2182_v9 = vadd.f32 0.1, %v2178_v26  ;;  %v2180_v3 = vmul.f32 0.9, %v2176_v19  ;;  %v2177_v2 = vsel %vm2113_vm3, %v3592_v31, %v2173_v51 }
 0x9be   : > { %v2183_v34 = vadd.f32 0.1, %v2179_v48  ;;  %v2181_v32 = vmul.f32 0.9, %v2177_v2 }
 0x9bf   : > { %v2191_v57 = vmul.f32 %v2182_v9, %v2182_v9  ;;  %v2184_v45 = vadd.f32 0.1, %v2180_v3 }
 0x9c0   : > { %v2192_v11 = vmul.f32 %v2183_v34, %v2183_v34  ;;  %v2185_v36 = vadd.f32 0.1, %v2181_v32 }
 0x9c1   : > { %2491 = vst [vmem:[%s3282_s15 + $0x60] sm:$0xff] %v2191_v57  ;;  %v2193_v53 = vmul.f32 %v2184_v45, %v2184_v45 }
 0x9c2   : > { %2492 = vst [vmem:[%s3282_s15 + $0x68] sm:$0xff] %v2192_v11  ;;  %v2194_v16 = vmul.f32 %v2185_v36, %v2185_v36 }
 0x9c3   : > { %2493 = vst [vmem:[%s3282_s15 + $0x70] sm:$0xff] %v2193_v53 }
 0x9c4   : > { %2494 = vst [vmem:[%s3282_s15 + $0x78] sm:$0xff] %v2194_v16 }
 0x9c5   : > { %2744 = shalt.err (!%p2741_p10)
}
 0x9c6   : > { %s2745_s15 = scalar_lea.hbm %s3627_s14, 2048  ;;  %s2749_s23 = scalar_lea.hbm %s3690_s8, 4096 }
 0x9c7   : > { %p2746_p12 = scmp.ne.s32.totalorder %s3627_s14, %s2745_s15  ;;  %p2750_p8 = scmp.lt.u32.totalorder %s3627_s14, %s3690_s8 }
 0x9c8   : > { %p2751_p11 = scmp.lt.u32.totalorder %s2749_s23, %s2745_s15  ;;  %p2753_p6 = scmp.lt.u32.totalorder %s2745_s15, %s3627_s14 }
 0x9c9   : > { %p2747_p1 = pnand %p2746_p12, %p3713_p9 }
 0x9ca   : > { %p2752_p0 = por %p2751_p11, %p2750_p8 }
 0x9cb   : > { %p2748_p3 = pneg %p2747_p1 }
 0x9cc   : > { %p2754_p13 = por %p2753_p6, %p2752_p0 }
 0x9ce   : > { %p2755_p2 = pnand %p2754_p13, %p2748_p3 }
 0x9d0   : > { %2758 = shalt.err (!%p2755_p2)
}
 0x9d1   : > { %2514 = dma.vmem_to_hbm [thread:$0]  (%p3713_p9), %s3629_s24, 2048, %s3627_s14, %s2206_s16, %s2824_s21, %s2824_s21, %s2825_s26  }
 0x9d2 PF: > { %s2256_s0 = sand.u32 1, %s2797_s27   ;;  %p3715_p5 = scmp.ne.s32.totalorder %s3702_s20, 0 }
 0x9d3   : > { %p3716_p4 = scmp.ge.s32.totalorder %s2817_s10, 2  ;;  %s2257_s30 = scalar_lea.sflag [#allocation4], %s2256_s0 }
 0x9d5   : > { %p2522_p7 = pnand %p3716_p4, %p3715_p5 }
 0x9d7   : > { %2788 = dma.done.wait (!%p2522_p7), %s2257_s30, 2048  }
 0x9d8   : > { %2790 = vsyncadd (!%p2522_p7), %s2257_s30, 4294965248  ;;  %s2266_s18 = scalar_lea.sflag [#allocation7], %s2256_s0 }
 0x9d9   : > { %2792 = dma.done.wait (!%p2522_p7), %s2266_s18, 2048  }
 0x9da   : > { %2794 = vsyncadd (!%p2522_p7), %s2266_s18, 4294965248  ;;  %s28_s10 = sadd.s32 1, %s2817_s10   ;;  %s3717_s27 = smov %s2801_s28 }
 0x9db   : > { %p25_p10 = scmp.ge.s32.totalorder %s28_s10, 4   ;;  %s3718_s28 = smov %s2805_s29 }
 0x9dc   : > { %s3719_s29 = smov %s2928_s19  ;;  %s3720_s30 = smov %s2813_s9 }
 0x9dd   : > { %s3721_s9 = smov %s3723_s13  ;;  %27 = sbr.rel (!%p25_p10) target bundleno = 10 (0xa), region = 121 }
 0x9e4   :  { %2271 = vsyncpa [#allocation3], 1 }
 0x9e5   :  { %2273 = vsyncpa [#allocation3 + $0x1], 1 }
 0x9e6   :  { %2274 = vsyncpa [#allocation4], 1 }
 0x9e7   :  { %2276 = vsyncpa [#allocation4 + $0x1], 1 }
 0x9e8   :  { %2277 = vsyncpa [#allocation7], 1 }
 0x9e9   :  { %2279 = vsyncpa [#allocation7 + $0x1], 1 }

</bundles_post_ra>
